<compile_context>
chip_gen: v6e
topology: v6e:2x2x1
jax: 0.10.0
libtpu: 0.0.40
codegen_flags: <defaults>
</compile_context>

<pallas_src>
import math
import functools

import jax
import jax.numpy as jnp
from jax.experimental import pallas as pl
from jax.experimental.pallas import tpu as pltpu

IN_FEATURES = 1280   # K
OUT_FEATURES = 768   # N


def _round_up(a, b):
    return ((a + b - 1) // b) * b


def _linear_kernel(x_ref, w_ref, b_ref, o_ref):
    # x_ref : [tm, K]  native dtype (streamed activation tile)
    # w_ref : [K, N]   bf16   (full pre-transposed weight, resident)
    # b_ref : [1, N]   f32    (full bias, resident)
    # o_ref : [tm, N]  x.dtype
    x = x_ref[...].astype(jnp.bfloat16)          # in-kernel cast, VPU
    acc = jnp.dot(x, w_ref[...],                  # canonical [M,K]@[K,N] on MXU
                  preferred_element_type=jnp.float32)
    o_ref[...] = (acc + b_ref[...]).astype(o_ref.dtype)


@functools.partial(jax.jit, static_argnames=("tm",))
def text_adapter_forward(x, weight, bias, *, tm=1024):
    """x: (..., 1280), weight: (768, 1280) [PyTorch layout], bias: (768,)."""
    orig_shape = x.shape
    M = 1
    for d in orig_shape[:-1]:
        M *= d
    K = orig_shape[-1]
    N = weight.shape[0]
    assert K == IN_FEATURES and N == OUT_FEATURES
    assert K % 128 == 0 and N % 128 == 0

    x2d = x.reshape(M, K)                         # streamed in native dtype

    # Tile selection:
    #   * tiny M  -> one step, 8-aligned block (unmasked sublane stores)
    #   * M > 256 -> at least 2 grid steps so both v7x TCs get work,
    #                tile a multiple of 256 (also 128-aligned for v5e MXU).
    if M <= 256:
        tm_eff = max(8, _round_up(M, 8))
    else:
        tm_eff = min(tm, _round_up(pl.cdiv(M, 2), 256))

    grid = (pl.cdiv(M, tm_eff),)                  # ragged last block is masked

    # One-time weight prep: bf16 + transpose to [K, N] so the kernel
    # contracts on the RHS sublane axis (no in-kernel re-layout).
    w_kn = jnp.transpose(weight.astype(jnp.bfloat16))   # [K, N]
    b2d = bias.astype(jnp.float32).reshape(1, N)         # [1, N]

    itemsize = x.dtype.itemsize
    cost = pl.CostEstimate(
        flops=2 * M * K * N,
        transcendentals=0,
        bytes_accessed=(M * K * itemsize          # x (native dtype, streamed)
                        + K * N * 2               # W (bf16, fetched once)
                        + N * 4                   # bias
                        + M * N * itemsize),      # output
    )

    out = pl.pallas_call(
        _linear_kernel,
        out_shape=jax.ShapeDtypeStruct((M, N), x.dtype),
        grid_spec=pltpu.PrefetchScalarGridSpec(
            num_scalar_prefetch=0,
            grid=grid,
            in_specs=[
                pl.BlockSpec((tm_eff, K), lambda i: (i, 0)),   # streamed x tile
                pl.BlockSpec((K, N), lambda i: (0, 0)),        # resident weight [K,N]
                pl.BlockSpec((1, N), lambda i: (0, 0)),        # resident bias
            ],
            out_specs=pl.BlockSpec((tm_eff, N), lambda i: (i, 0)),
        ),
        compiler_params=pltpu.CompilerParams(
            dimension_semantics=("parallel",),
            # tm=1024: ~2*(5 MiB x + 3 MiB out) + ~4 MiB weight < 40 MiB.
            # Raised above v5e's 16 MiB scoped default; well under v7x's
            # 64 MiB physical VMEM.
            vmem_limit_bytes=40 * 1024 * 1024,
        ),
        cost_estimate=cost,
    )(x2d, w_kn, b2d)

    return out.reshape(*orig_shape[:-1], N)


def init_text_adapter_params(key):
    """Deterministic init matching nn.Linear weight + kaiming_uniform_(a=sqrt(5)),
    bias zeroed (as in the module's __init__)."""
    a = math.sqrt(5)
    gain = math.sqrt(2.0 / (1.0 + a * a))
    fan_in = IN_FEATURES
    bound = gain * math.sqrt(3.0 / fan_in)        # = sqrt(1/1280)
    weight = jax.random.uniform(
        key, (OUT_FEATURES, IN_FEATURES), jnp.float32, minval=-bound, maxval=bound
    )
    bias = jnp.zeros((OUT_FEATURES,), jnp.float32)
    return weight, bias


def _reference(x, weight, bias):
    # Same bf16 operand rounding as the kernel, f32 accumulation.
    xb = x.astype(jnp.bfloat16).astype(jnp.float32)
    wb = weight.astype(jnp.bfloat16).astype(jnp.float32)
    return jnp.einsum("...k,nk->...n", xb, wb,
                      precision=jax.lax.Precision.HIGHEST) + bias


if __name__ == "__main__":
    key = jax.random.PRNGKey(0)
    k_w, k_x1, k_x2 = jax.random.split(key, 3)

    weight, bias = init_text_adapter_params(k_w)

    # 1) Small example: batch=2, seq=8, features=1280 (fixed by the module).
    x1 = jax.random.normal(k_x1, (2, 8, IN_FEATURES), jnp.float32)
    y1 = jax.block_until_ready(text_adapter_forward(x1, weight, bias))
    assert y1.shape == (2, 8, OUT_FEATURES)
    assert jnp.allclose(y1, _reference(x1, weight, bias), atol=1e-2, rtol=1e-2)

    # 2) Multi-step grid + ragged (masked) last block: M = 400 -> tm=256, grid=2.
    x2 = jax.random.normal(k_x2, (2, 200, IN_FEATURES), jnp.float32)
    y2 = jax.block_until_ready(text_adapter_forward(x2, weight, bias))
    assert y2.shape == (2, 200, OUT_FEATURES)
    assert jnp.allclose(y2, _reference(x2, weight, bias), atol=1e-2, rtol=1e-2)

    print("KERNEL_OK")
</pallas_src>

<mosaic_0001>
module attributes {stable_mosaic.version = 11 : i64} {
  func.func @_linear_kernel(%arg0: i32, %arg1: memref<16x1280xf32, #tpu.memory_space<vmem>>, %arg2: memref<1280x768xbf16, #tpu.memory_space<vmem>>, %arg3: memref<1x768xf32, #tpu.memory_space<vmem>>, %arg4: memref<16x768xf32, #tpu.memory_space<vmem>>) attributes {dimension_semantics = [#tpu.dimension_semantics<parallel>], iteration_bounds = array<i64: 1>, scalar_prefetch = 0 : i64, scratch_operands = 0 : i64, tpu.core_type = #tpu.core_type<tc>, window_params = [{transform_indices = @transform_0, window_bounds = array<i64: 16, 1280>}, {pipeline_mode = #tpu.pipeline_mode<synchronous>, transform_indices = @transform_1, window_bounds = array<i64: 1280, 768>}, {pipeline_mode = #tpu.pipeline_mode<synchronous>, transform_indices = @transform_2, window_bounds = array<i64: 1, 768>}, {transform_indices = @transform_3, window_bounds = array<i64: 16, 768>}]} {
    %c0 = arith.constant 0 : index
    %c0_0 = arith.constant 0 : index
    %0 = vector.load %arg1[%c0, %c0_0] : memref<16x1280xf32, #tpu.memory_space<vmem>>, vector<16x1280xf32>
    %1 = arith.truncf %0 : vector<16x1280xf32> to vector<16x1280xbf16>
    %c0_1 = arith.constant 0 : index
    %c0_2 = arith.constant 0 : index
    %2 = vector.load %arg2[%c0_1, %c0_2] : memref<1280x768xbf16, #tpu.memory_space<vmem>>, vector<1280x768xbf16>
    %cst = arith.constant dense<0.000000e+00> : vector<16x768xf32>
    %3 = tpu.matmul %1, %2, %cst {dimension_numbers = #tpu.dot_dimension_numbers<[1], [0], [0], [1], [0, 0, 1, 1], [], []>} : vector<16x1280xbf16>, vector<1280x768xbf16>, vector<16x768xf32> -> vector<16x768xf32>
    %c0_3 = arith.constant 0 : index
    %c0_4 = arith.constant 0 : index
    %4 = vector.load %arg3[%c0_3, %c0_4] : memref<1x768xf32, #tpu.memory_space<vmem>>, vector<1x768xf32>
    %5 = vector.broadcast %4 : vector<1x768xf32> to vector<16x768xf32>
    %6 = arith.addf %3, %5 : vector<16x768xf32>
    %c0_5 = arith.constant 0 : index
    %c0_6 = arith.constant 0 : index
    %7 = vector.load %arg4[%c0_5, %c0_6] : memref<16x768xf32, #tpu.memory_space<vmem>>, vector<16x768xf32>
    tpu.vector_store %arg4[%c0_5, %c0_6], %6 {strides = array<i32>} : memref<16x768xf32, #tpu.memory_space<vmem>>, vector<16x768xf32>,
    return
  }
  func.func @transform_0(%arg0: i32) -> (i32, i32) {
    %c0_i32 = arith.constant 0 : i32
    %c0_i32_0 = arith.constant 0 : i32
    return %arg0, %c0_i32 : i32, i32
  }
  func.func @transform_1(%arg0: i32) -> (i32, i32) {
    %c0_i32 = arith.constant 0 : i32
    %c0_i32_0 = arith.constant 0 : i32
    %c0_i32_1 = arith.constant 0 : i32
    return %c0_i32, %c0_i32_0 : i32, i32
  }
  func.func @transform_2(%arg0: i32) -> (i32, i32) {
    %c0_i32 = arith.constant 0 : i32
    %c0_i32_0 = arith.constant 0 : i32
    %c0_i32_1 = arith.constant 0 : i32
    return %c0_i32, %c0_i32_0 : i32, i32
  }
  func.func @transform_3(%arg0: i32) -> (i32, i32) {
    %c0_i32 = arith.constant 0 : i32
    %c0_i32_0 = arith.constant 0 : i32
    return %arg0, %c0_i32 : i32, i32
  }
}

</mosaic_0001>

<bundles_post_ra>
// kernel: text_adapter_forward.1
= control target key start
LH: loop header
LB: loop body
LE: loop exit
PB: predicated region body
PF: predicated region fallthrough
CT: control target
= control target key end

     0   :  { %s6450_s0 = inlined_call_operand.vmem [shape: f32[16,1280], index: 0, kind: input, shape index: {}]   ;;  %s6451_s1 = inlined_call_operand.vmem [shape: bf16[1280,768], index: 1, kind: input, shape index: {}]   ;;  %s6452_s2 = inlined_call_operand.vmem [shape: f32[1,768], index: 2, kind: input, shape index: {}]   ;;  %s6453_s3 = inlined_call_operand.hbm [shape: f32[16,768], index: 3, kind: output, shape index: {}]  }
   0x1   :  { %v4113_v0 = vld [vmem:[%s6451_s1 + $0x154] ss:$24 sps:$4 sm:$0xff]   ;;  %v4115_v1 = vld [vmem:[%s6451_s1 + $0x150] ss:$24 sps:$4 sm:$0xff]   ;;  %v4119_v4 = vld [vmem:[%s6451_s1 + $0x124] ss:$24 sps:$4 sm:$0xff]  }
   0x2   :  { %2957 = vmatprep.subr.bf16.mxu0 %v4113_v0  ;;  %v4116_v2 = vld [vmem:[%s6451_s1 + $0x454] ss:$24 sps:$4 sm:$0xff]   ;;  %v4118_v3 = vld [vmem:[%s6451_s1 + $0x450] ss:$24 sps:$4 sm:$0xff]   ;;  %v4121_v5 = vld [vmem:[%s6451_s1 + $0x120] ss:$24 sps:$4 sm:$0xff]  }
   0x3   :  { %2958 = vmatpush1.bf16.msra.mxu0 %v4115_v1  ;;  %3000 = vmatprep.subr.bf16.mxu1 %v4116_v2  ;;  %v4122_v6 = vld [vmem:[%s6451_s1 + $0x424] ss:$24 sps:$4 sm:$0xff]   ;;  %v4124_v7 = vld [vmem:[%s6451_s1 + $0x420] ss:$24 sps:$4 sm:$0xff]   ;;  %v4125_v8 = vld [vmem:[%s6451_s1 + $0xf4] ss:$24 sps:$4 sm:$0xff]  }
   0x4   :  { %3001 = vmatpush1.bf16.msra.mxu1 %v4118_v3  ;;  %2959 = vmatprep.subr.bf16.mxu0 %v4119_v4  ;;  %v4127_v9 = vld [vmem:[%s6451_s1 + $0xf0] ss:$24 sps:$4 sm:$0xff]   ;;  %v4128_v10 = vld [vmem:[%s6451_s1 + $0x3f4] ss:$24 sps:$4 sm:$0xff]   ;;  %v4131_v11 = vld [vmem:[%s6451_s1 + $0xc4] ss:$24 sps:$4 sm:$0xff]  }
   0x5   :  { %3002 = vmatprep.subr.bf16.mxu1 %v4122_v6  ;;  %v4130_v12 = vld [vmem:[%s6451_s1 + $0x3f0] ss:$24 sps:$4 sm:$0xff]   ;;  %v4134_v13 = vld [vmem:[%s6451_s1 + $0x3c4] ss:$24 sps:$4 sm:$0xff]   ;;  %v4133_v14 = vld [vmem:[%s6451_s1 + $0xc0] ss:$24 sps:$4 sm:$0xff]  }
   0x6   :  { %v4137_v15 = vld [vmem:[%s6451_s1 + $0x94] ss:$24 sps:$4 sm:$0xff]   ;;  %v4136_v16 = vld [vmem:[%s6451_s1 + $0x3c0] ss:$24 sps:$4 sm:$0xff]   ;;  %v4139_v18 = vld [vmem:[%s6451_s1 + $0x90] ss:$24 sps:$4 sm:$0xff]  }
   0x7   :  { %2960 = vmatpush1.bf16.msra.mxu0 %v4121_v5  ;;  %v4140_v17 = vld [vmem:[%s6451_s1 + $0x394] ss:$24 sps:$4 sm:$0xff]   ;;  %v4143_v19 = vld [vmem:[%s6451_s1 + $0x64] ss:$24 sps:$4 sm:$0xff]   ;;  %v4142_v20 = vld [vmem:[%s6451_s1 + $0x390] ss:$24 sps:$4 sm:$0xff]  }
   0x8   :  { %2961 = vmatprep.subr.bf16.mxu0 %v4125_v8  ;;  %3003 = vmatpush1.bf16.msra.mxu1 %v4124_v7  ;;  %v4146_v21 = vld [vmem:[%s6451_s1 + $0x364] ss:$24 sps:$4 sm:$0xff]   ;;  %v4145_v22 = vld [vmem:[%s6451_s1 + $0x60] ss:$24 sps:$4 sm:$0xff]   ;;  %v4149_v23 = vld [vmem:[%s6451_s1 + $0x34] ss:$24 sps:$4 sm:$0xff]  }
   0x9   :  { %3004 = vmatprep.subr.bf16.mxu1 %v4128_v10  ;;  %v4148_v24 = vld [vmem:[%s6451_s1 + $0x360] ss:$24 sps:$4 sm:$0xff]   ;;  %v4152_v25 = vld [vmem:[%s6451_s1 + $0x334] ss:$24 sps:$4 sm:$0xff]   ;;  %v4151_v26 = vld [vmem:[%s6451_s1 + $0x30] ss:$24 sps:$4 sm:$0xff]  }
   0xa   :  { %v4155_v27 = vld [vmem:[%s6451_s1 + $0x4] ss:$24 sps:$4 sm:$0xff]   ;;  %v4154_v28 = vld [vmem:[%s6451_s1 + $0x330] ss:$24 sps:$4 sm:$0xff]   ;;  %v4157_v30 = vld [vmem:[%s6451_s1] ss:$24 sps:$4 sm:$0xff]  }
   0xb   :  { %2962 = vmatpush1.bf16.msra.mxu0 %v4127_v9  ;;  %v4158_v29 = vld [vmem:[%s6451_s1 + $0x304] ss:$24 sps:$4 sm:$0xff]   ;;  %v4161_v31 = vld [vmem:[%s6451_s1 + $0x2d4] ss:$24 sps:$4 sm:$0xff]   ;;  %v4160_v32 = vld [vmem:[%s6451_s1 + $0x300] ss:$24 sps:$4 sm:$0xff]  }
   0xc   :  { %2963 = vmatprep.subr.bf16.mxu0 %v4131_v11  ;;  %3005 = vmatpush1.bf16.msra.mxu1 %v4130_v12  ;;  %v4164_v33 = vld [vmem:[%s6451_s1 + $0x5d4] ss:$24 sps:$4 sm:$0xff]   ;;  %v4163_v34 = vld [vmem:[%s6451_s1 + $0x2d0] ss:$24 sps:$4 sm:$0xff]   ;;  %v4167_v35 = vld [vmem:[%s6451_s1 + $0x2a4] ss:$24 sps:$4 sm:$0xff]  }
   0xd   :  { %3006 = vmatprep.subr.bf16.mxu1 %v4134_v13  ;;  %v4166_v36 = vld [vmem:[%s6451_s1 + $0x5d0] ss:$24 sps:$4 sm:$0xff]   ;;  %v4170_v37 = vld [vmem:[%s6451_s1 + $0x5a4] ss:$24 sps:$4 sm:$0xff]   ;;  %v4169_v38 = vld [vmem:[%s6451_s1 + $0x2a0] ss:$24 sps:$4 sm:$0xff]  }
   0xe   :  { %v4173_v39 = vld [vmem:[%s6451_s1 + $0x274] ss:$24 sps:$4 sm:$0xff]   ;;  %v4172_v40 = vld [vmem:[%s6451_s1 + $0x5a0] ss:$24 sps:$4 sm:$0xff]   ;;  %v4175_v42 = vld [vmem:[%s6451_s1 + $0x270] ss:$24 sps:$4 sm:$0xff]  }
   0xf   :  { %2964 = vmatpush1.bf16.msra.mxu0 %v4133_v14  ;;  %v4176_v41 = vld [vmem:[%s6451_s1 + $0x574] ss:$24 sps:$4 sm:$0xff]   ;;  %v4179_v43 = vld [vmem:[%s6451_s1 + $0x244] ss:$24 sps:$4 sm:$0xff]   ;;  %v4178_v44 = vld [vmem:[%s6451_s1 + $0x570] ss:$24 sps:$4 sm:$0xff]  }
  0x10   :  { %2965 = vmatprep.subr.bf16.mxu0 %v4137_v15  ;;  %3007 = vmatpush1.bf16.msra.mxu1 %v4136_v16  ;;  %v4182_v45 = vld [vmem:[%s6451_s1 + $0x544] ss:$24 sps:$4 sm:$0xff]   ;;  %v16_v46 = vld [vmem:[%s6450_s0 + $0x8] sm:$0xff]  ;;  %v4181_v48 = vld [vmem:[%s6451_s1 + $0x240] ss:$24 sps:$4 sm:$0xff]  }
  0x11   :  { %3008 = vmatprep.subr.bf16.mxu1 %v4140_v17  ;;  %v26_v47 = vld [vmem:[%s6450_s0 + $0x58] sm:$0xff]  ;;  %v4185_v50 = vld [vmem:[%s6451_s1 + $0x214] ss:$24 sps:$4 sm:$0xff]   ;;  %v4187_v56 = vld [vmem:[%s6451_s1 + $0x210] ss:$24 sps:$4 sm:$0xff]  }
  0x12   :  { %v5025_v49 = vpack.c.bf16 %v26_v47, %v16_v46  ;;  %v4184_v51 = vld [vmem:[%s6451_s1 + $0x540] ss:$24 sps:$4 sm:$0xff]   ;;  %v28_v53 = vld [vmem:[%s6450_s0 + $0x68] sm:$0xff]  ;;  %v4191_v57 = vld [vmem:[%s6451_s1 + $0x1e4] ss:$24 sps:$4 sm:$0xff]  }
  0x13   :  { %2966 = vmatpush1.bf16.msra.mxu0 %v4139_v18  ;;  %v18_v52 = vld [vmem:[%s6450_s0 + $0x18] sm:$0xff]  ;;  %v4188_v54 = vld [vmem:[%s6451_s1 + $0x514] ss:$24 sps:$4 sm:$0xff]   ;;  %v4190_v58 = vld [vmem:[%s6451_s1 + $0x510] ss:$24 sps:$4 sm:$0xff]  }
  0x14   :  { %2967 = vmatprep.subr.bf16.mxu0 %v4143_v19  ;;  %3009 = vmatpush1.bf16.msra.mxu1 %v4142_v20  ;;  %v5043_v55 = vpack.c.bf16 %v28_v53, %v18_v52  ;;  %v4194_v59 = vld [vmem:[%s6451_s1 + $0x4e4] ss:$24 sps:$4 sm:$0xff]   ;;  %v4193_v60 = vld [vmem:[%s6451_s1 + $0x1e0] ss:$24 sps:$4 sm:$0xff]   ;;  %v4197_v61 = vld [vmem:[%s6451_s1 + $0x1b4] ss:$24 sps:$4 sm:$0xff]  }
  0x15   :  { %3010 = vmatprep.subr.bf16.mxu1 %v4146_v21  ;;  %2989 = vmatprep.mubr.bf16.mxu0 %v5025_v49  ;;  %v4196_v62 = vld [vmem:[%s6451_s1 + $0x4e0] ss:$24 sps:$4 sm:$0xff]   ;;  %v4200_v63 = vld [vmem:[%s6451_s1 + $0x4b4] ss:$24 sps:$4 sm:$0xff]   ;;  %v4199_v0 = vld [vmem:[%s6451_s1 + $0x1b0] ss:$24 sps:$4 sm:$0xff]  }
  0x16   :  { %3032 = vmatprep.mubr.bf16.mxu1 %v5043_v55  ;;  %v4202_v1 = vld [vmem:[%s6451_s1 + $0x4b0] ss:$24 sps:$4 sm:$0xff]   ;;  %v4203_v2 = vld [vmem:[%s6451_s1 + $0x184] ss:$24 sps:$4 sm:$0xff]   ;;  %v4205_v3 = vld [vmem:[%s6451_s1 + $0x180] ss:$24 sps:$4 sm:$0xff]  }
  0x17   :  { %2968 = vmatpush1.bf16.msra.mxu0 %v4145_v22  ;;  %v4206_v4 = vld [vmem:[%s6451_s1 + $0x484] ss:$24 sps:$4 sm:$0xff]   ;;  %v4208_v6 = vld [vmem:[%s6451_s1 + $0x480] ss:$24 sps:$4 sm:$0xff]   ;;  %v25_v7 = vld [vmem:[%s6450_s0 + $0x50] sm:$0xff] }
  0x18   :  { %2969 = vmatprep.subr.bf16.mxu0 %v4149_v23  ;;  %3011 = vmatpush1.bf16.msra.mxu1 %v4148_v24  ;;  %v15_v5 = vld [vmem:[%s6450_s0] sm:$0xff]  ;;  %v4211_v8 = vld [vmem:[%s6451_s1 + $0x754] ss:$24 sps:$4 sm:$0xff]   ;;  %v4209_v13 = vld [vmem:[%s6451_s1 + $0x750] ss:$24 sps:$4 sm:$0xff]  }
  0x19   :  { %3012 = vmatprep.subr.bf16.mxu1 %v4152_v25  ;;  %v17_v9 = vld [vmem:[%s6450_s0 + $0x10] sm:$0xff]  ;;  %v27_v10 = vld [vmem:[%s6450_s0 + $0x60] sm:$0xff]  ;;  %v5103_v11 = vpack.c.bf16 %v25_v7, %v15_v5  ;;  %v32_v47 = vld [vmem:[%s6450_s0 + $0x88] sm:$0xff] }
  0x1a   :  { %v4214_v12 = vld [vmem:[%s6451_s1 + $0xa54] ss:$24 sps:$4 sm:$0xff]   ;;  %v5111_v14 = vpack.c.bf16 %v27_v10, %v17_v9  ;;  %v4217_v15 = vld [vmem:[%s6451_s1 + $0x724] ss:$24 sps:$4 sm:$0xff]   ;;  %v4212_v16 = vld [vmem:[%s6451_s1 + $0xa50] ss:$24 sps:$4 sm:$0xff]  }
  0x1b   :  { %2970 = vmatpush1.bf16.msra.mxu0 %v4151_v26  ;;  %v4220_v17 = vld [vmem:[%s6451_s1 + $0xa24] ss:$24 sps:$4 sm:$0xff]   ;;  %v4215_v18 = vld [vmem:[%s6451_s1 + $0x720] ss:$24 sps:$4 sm:$0xff]   ;;  %v4223_v19 = vld [vmem:[%s6451_s1 + $0x6f4] ss:$24 sps:$4 sm:$0xff]  }
  0x1c   :  { %2971 = vmatprep.subr.bf16.mxu0 %v4155_v27  ;;  %3013 = vmatpush1.bf16.msra.mxu1 %v4154_v28  ;;  %v4218_v20 = vld [vmem:[%s6451_s1 + $0xa20] ss:$24 sps:$4 sm:$0xff]   ;;  %v4226_v21 = vld [vmem:[%s6451_s1 + $0x9f4] ss:$24 sps:$4 sm:$0xff]   ;;  %v4221_v22 = vld [vmem:[%s6451_s1 + $0x6f0] ss:$24 sps:$4 sm:$0xff]  }
  0x1d   :  { %3014 = vmatprep.subr.bf16.mxu1 %v4158_v29  ;;  %v4229_v23 = vld [vmem:[%s6451_s1 + $0x6c4] ss:$24 sps:$4 sm:$0xff]   ;;  %v4224_v24 = vld [vmem:[%s6451_s1 + $0x9f0] ss:$24 sps:$4 sm:$0xff]   ;;  %v4227_v26 = vld [vmem:[%s6451_s1 + $0x6c0] ss:$24 sps:$4 sm:$0xff]  }
  0x1e   :  { %v4232_v25 = vld [vmem:[%s6451_s1 + $0x9c4] ss:$24 sps:$4 sm:$0xff]   ;;  %v4235_v27 = vld [vmem:[%s6451_s1 + $0x694] ss:$24 sps:$4 sm:$0xff]   ;;  %v4230_v28 = vld [vmem:[%s6451_s1 + $0x9c0] ss:$24 sps:$4 sm:$0xff]  }
  0x1f   :  { %2972 = vmatpush1.bf16.msra.mxu0 %v4157_v30  ;;  %v4238_v29 = vld [vmem:[%s6451_s1 + $0x994] ss:$24 sps:$4 sm:$0xff]   ;;  %v4233_v30 = vld [vmem:[%s6451_s1 + $0x690] ss:$24 sps:$4 sm:$0xff]   ;;  %v4251_v46 = vld [vmem:[%s6451_s1 + $0x600] ss:$24 sps:$4 sm:$0xff]  }
  0x20   :  { %2973 = vmatprep.subr.bf16.mxu0 %v4161_v31  ;;  %3015 = vmatpush1.bf16.msra.mxu1 %v4160_v32  ;;  %v4241_v31 = vld [vmem:[%s6451_s1 + $0x664] ss:$24 sps:$4 sm:$0xff]   ;;  %v4236_v32 = vld [vmem:[%s6451_s1 + $0x990] ss:$24 sps:$4 sm:$0xff]   ;;  %v4262_v52 = vld [vmem:[%s6451_s1 + $0xbd4] ss:$24 sps:$4 sm:$0xff]  }
  0x21   :  { %3016 = vmatprep.subr.bf16.mxu1 %v4164_v33  ;;  %v4244_v33 = vld [vmem:[%s6451_s1 + $0x964] ss:$24 sps:$4 sm:$0xff]   ;;  %v4257_v53 = vld [vmem:[%s6451_s1 + $0x8d0] ss:$24 sps:$4 sm:$0xff]   ;;  %v4286_v5 = vld [vmem:[%s6451_s1 + $0xb14] ss:$24 sps:$4 sm:$0xff]  }
  0x22   :  { %v4289_v7 = vld [vmem:[%s6451_s1 + $0x7e4] ss:$24 sps:$4 sm:$0xff]   ;;  %v4287_v10 = vld [vmem:[%s6451_s1 + $0x7e0] ss:$24 sps:$4 sm:$0xff]  }
  0x23   :  { %2974 = vmatpush2.bf16.msra.mxu0 %v4163_v34  ;;  %v4239_v34 = vld [vmem:[%s6451_s1 + $0x660] ss:$24 sps:$4 sm:$0xff]   ;;  %v4292_v9 = vld [vmem:[%s6451_s1 + $0xae4] ss:$24 sps:$4 sm:$0xff]  }
  0x24   :  { %2975 = vmatprep.subr.bf16.mxu0 %v4167_v35  ;;  %3017 = vmatpush2.bf16.msra.mxu1 %v4166_v36  ;;  %v4247_v35 = vld [vmem:[%s6451_s1 + $0x634] ss:$24 sps:$4 sm:$0xff]   ;;  %v4242_v36 = vld [vmem:[%s6451_s1 + $0x960] ss:$24 sps:$4 sm:$0xff]  }
  0x25   :  { %3018 = vmatprep.subr.bf16.mxu1 %v4170_v37  ;;  %v4250_v37 = vld [vmem:[%s6451_s1 + $0x934] ss:$24 sps:$4 sm:$0xff]  }
  0x27   :  { %2976 = vmatpush2.bf16.msra.mxu0 %v4169_v38  ;;  %v4245_v38 = vld [vmem:[%s6451_s1 + $0x630] ss:$24 sps:$4 sm:$0xff]  }
  0x28   :  { %2977 = vmatprep.subr.bf16.mxu0 %v4173_v39  ;;  %3019 = vmatpush2.bf16.msra.mxu1 %v4172_v40  ;;  %v4253_v39 = vld [vmem:[%s6451_s1 + $0x604] ss:$24 sps:$4 sm:$0xff]   ;;  %v20_v40 = vld [vmem:[%s6450_s0 + $0x28] sm:$0xff] }
  0x29   :  { %3020 = vmatprep.subr.bf16.mxu1 %v4176_v41  ;;  %v30_v41 = vld [vmem:[%s6450_s0 + $0x78] sm:$0xff] }
  0x2b   :  { %2978 = vmatpush2.bf16.msra.mxu0 %v4175_v42  ;;  %v4248_v42 = vld [vmem:[%s6451_s1 + $0x930] ss:$24 sps:$4 sm:$0xff]  }
  0x2c   :  { %2979 = vmatprep.subr.bf16.mxu0 %v4179_v43  ;;  %3021 = vmatpush2.bf16.msra.mxu1 %v4178_v44  ;;  %v5199_v43 = vpack.c.bf16 %v30_v41, %v20_v40  ;;  %v4256_v44 = vld [vmem:[%s6451_s1 + $0x904] ss:$24 sps:$4 sm:$0xff]   ;;  %v4317_v41 = vld [vmem:[%s6451_s1 + $0xcf0] ss:$24 sps:$4 sm:$0xff]  }
  0x2d   :  { %3022 = vmatprep.subr.bf16.mxu1 %v4182_v45  ;;  %v22_v45 = vld [vmem:[%s6450_s0 + $0x38] sm:$0xff] }
  0x2f   :  { %2980 = vmatpush2.bf16.msra.mxu0 %v4181_v48  ;;  %v4259_v48 = vld [vmem:[%s6451_s1 + $0x8d4] ss:$24 sps:$4 sm:$0xff]  }
  0x30   :  { %2981 = vmatprep.subr.bf16.mxu0 %v4185_v50  ;;  %3023 = vmatpush2.bf16.msra.mxu1 %v4184_v51  ;;  %v5217_v50 = vpack.c.bf16 %v32_v47, %v22_v45  ;;  %v4254_v51 = vld [vmem:[%s6451_s1 + $0x900] ss:$24 sps:$4 sm:$0xff]   ;;  %v4328_v45 = vld [vmem:[%s6451_s1 + $0xcc] ss:$24 sps:$4 sm:$0xff]  }
  0x31   :  { %3024 = vmatprep.subr.bf16.mxu1 %v4188_v54  ;;  %v4265_v54 = vld [vmem:[%s6451_s1 + $0x8a4] ss:$24 sps:$4 sm:$0xff]   ;;  %v4331_v47 = vld [vmem:[%s6451_s1 + $0xc94] ss:$24 sps:$4 sm:$0xff]  }
  0x33   :  { %2982 = vmatpush2.bf16.msra.mxu0 %v4187_v56  ;;  %v4260_v56 = vld [vmem:[%s6451_s1 + $0xbd0] ss:$24 sps:$4 sm:$0xff]  }
  0x34   :  { %2983 = vmatprep.subr.bf16.mxu0 %v4191_v57  ;;  %3025 = vmatpush2.bf16.msra.mxu1 %v4190_v58  ;;  %v4268_v57 = vld [vmem:[%s6451_s1 + $0xba4] ss:$24 sps:$4 sm:$0xff]   ;;  %v4263_v58 = vld [vmem:[%s6451_s1 + $0x8a0] ss:$24 sps:$4 sm:$0xff]  }
  0x35   :  { %3026 = vmatprep.subr.bf16.mxu1 %v4194_v59  ;;  %v4271_v59 = vld [vmem:[%s6451_s1 + $0x874] ss:$24 sps:$4 sm:$0xff]  }
  0x37   :  { %2984 = vmatpush2.bf16.msra.mxu0 %v4193_v60  ;;  %v4266_v60 = vld [vmem:[%s6451_s1 + $0xba0] ss:$24 sps:$4 sm:$0xff]  }
  0x38   :  { %2985 = vmatprep.subr.bf16.mxu0 %v4197_v61  ;;  %3027 = vmatpush2.bf16.msra.mxu1 %v4196_v62  ;;  %v4274_v61 = vld [vmem:[%s6451_s1 + $0xb74] ss:$24 sps:$4 sm:$0xff]   ;;  %v4269_v62 = vld [vmem:[%s6451_s1 + $0x870] ss:$24 sps:$4 sm:$0xff]  }
  0x39   :  { %3028 = vmatprep.subr.bf16.mxu1 %v4200_v63  ;;  %v4277_v63 = vld [vmem:[%s6451_s1 + $0x844] ss:$24 sps:$4 sm:$0xff]  }
  0x3b   :  { %2986 = vmatpush2.bf16.msra.mxu0 %v4199_v0  ;;  %v4272_v0 = vld [vmem:[%s6451_s1 + $0xb70] ss:$24 sps:$4 sm:$0xff]  }
  0x3c   :  { %2987 = vmatprep.subr.bf16.mxu0 %v4203_v2  ;;  %3029 = vmatpush2.bf16.msra.mxu1 %v4202_v1  ;;  %v4280_v1 = vld [vmem:[%s6451_s1 + $0xb44] ss:$24 sps:$4 sm:$0xff]   ;;  %v4275_v2 = vld [vmem:[%s6451_s1 + $0x840] ss:$24 sps:$4 sm:$0xff]  }
  0x3d   :  { %3030 = vmatprep.subr.bf16.mxu1 %v4206_v4  ;;  %v4278_v4 = vld [vmem:[%s6451_s1 + $0xb40] ss:$24 sps:$4 sm:$0xff]  }
  0x3f   :  { %2988 = vmatpush2.bf16.msra.mxu0 %v4205_v3  ;;  %v4283_v3 = vld [vmem:[%s6451_s1 + $0x814] ss:$24 sps:$4 sm:$0xff]  }
  0x40   :  { %3043 = vmatprep.subr.bf16.mxu0 %v4211_v8  ;;  %3031 = vmatpush2.bf16.msra.mxu1 %v4208_v6  ;;  %v4281_v6 = vld [vmem:[%s6451_s1 + $0x810] ss:$24 sps:$4 sm:$0xff]  }
  0x41   :  { %3086 = vmatprep.subr.bf16.mxu1 %v4214_v12  ;;  %v4284_v8 = vld [vmem:[%s6451_s1 + $0xb10] ss:$24 sps:$4 sm:$0xff]   ;;  %v4295_v12 = vld [vmem:[%s6451_s1 + $0x7b4] ss:$24 sps:$4 sm:$0xff]  }
  0x42   :  { %2990 = vmatmul.mubr.bf16.vlgmr.msra.gmra.mxu0 %v5103_v11 }
  0x43   :  { %3044 = vmatpush1.bf16.msra.mxu0 %v4209_v13  ;;  %3033 = vmatmul.mubr.bf16.vlgmr.msra.gmra.mxu1 %v5111_v14  ;;  %v4290_v13 = vld [vmem:[%s6451_s1 + $0xae0] ss:$24 sps:$4 sm:$0xff]  }
  0x44   :  { %3045 = vmatprep.subr.bf16.mxu0 %v4217_v15  ;;  %3087 = vmatpush1.bf16.msra.mxu1 %v4212_v16  ;;  %v4298_v15 = vld [vmem:[%s6451_s1 + $0xab4] ss:$24 sps:$4 sm:$0xff]   ;;  %v4293_v16 = vld [vmem:[%s6451_s1 + $0x7b0] ss:$24 sps:$4 sm:$0xff]  }
  0x45   :  { %3088 = vmatprep.subr.bf16.mxu1 %v4220_v17  ;;  %3075 = vmatprep.mubr.bf16.mxu0 %v5199_v43  ;;  %v4296_v17 = vld [vmem:[%s6451_s1 + $0xab0] ss:$24 sps:$4 sm:$0xff]  }
  0x46   :  { %3118 = vmatprep.mubr.bf16.mxu1 %v5217_v50 }
  0x47   :  { %3046 = vmatpush1.bf16.msra.mxu0 %v4215_v18  ;;  %v4301_v18 = vld [vmem:[%s6451_s1 + $0x784] ss:$24 sps:$4 sm:$0xff]  }
  0x48   :  { %3047 = vmatprep.subr.bf16.mxu0 %v4223_v19  ;;  %3089 = vmatpush1.bf16.msra.mxu1 %v4218_v20  ;;  %v4299_v19 = vld [vmem:[%s6451_s1 + $0x780] ss:$24 sps:$4 sm:$0xff]   ;;  %v4304_v20 = vld [vmem:[%s6451_s1 + $0xa84] ss:$24 sps:$4 sm:$0xff]  }
  0x49   :  { %3090 = vmatprep.subr.bf16.mxu1 %v4226_v21  ;;  %v19_v21 = vld [vmem:[%s6450_s0 + $0x20] sm:$0xff] }
  0x4b   :  { %3048 = vmatpush1.bf16.msra.mxu0 %v4221_v22  ;;  %v4302_v22 = vld [vmem:[%s6451_s1 + $0xa80] ss:$24 sps:$4 sm:$0xff]  }
  0x4c   :  { %3049 = vmatprep.subr.bf16.mxu0 %v4229_v23  ;;  %3091 = vmatpush1.bf16.msra.mxu1 %v4224_v24  ;;  %v29_v23 = vld [vmem:[%s6450_s0 + $0x70] sm:$0xff] }
  0x4d   :  { %3092 = vmatprep.subr.bf16.mxu1 %v4232_v25  ;;  %v4307_v24 = vld [vmem:[%s6451_s1 + $0xd54] ss:$24 sps:$4 sm:$0xff]  }
  0x4e   :  { %v21_v25 = vld [vmem:[%s6450_s0 + $0x30] sm:$0xff] }
  0x4f   :  { %3050 = vmatpush1.bf16.msra.mxu0 %v4227_v26  ;;  %v31_v26 = vld [vmem:[%s6450_s0 + $0x80] sm:$0xff] }
  0x50   :  { %3051 = vmatprep.subr.bf16.mxu0 %v4235_v27  ;;  %3093 = vmatpush1.bf16.msra.mxu1 %v4230_v28  ;;  %v5331_v27 = vpack.c.bf16 %v29_v23, %v19_v21  ;;  %v4310_v28 = vld [vmem:[%s6451_s1 + $0x15c] ss:$24 sps:$4 sm:$0xff]   ;;  %v4374_v21 = vld [vmem:[%s6451_s1 + $0x248] ss:$24 sps:$4 sm:$0xff]  }
  0x51   :  { %3094 = vmatprep.subr.bf16.mxu1 %v4238_v29  ;;  %v4305_v29 = vld [vmem:[%s6451_s1 + $0xd50] ss:$24 sps:$4 sm:$0xff]  }
  0x52   :  { %v4377_v23 = vld [vmem:[%s6451_s1 + $0xe10] ss:$24 sps:$4 sm:$0xff]  }
  0x53   :  { %3052 = vmatpush1.bf16.msra.mxu0 %v4233_v30  ;;  %v5339_v30 = vpack.c.bf16 %v31_v26, %v21_v25  ;;  %v4380_v25 = vld [vmem:[%s6451_s1 + $0x218] ss:$24 sps:$4 sm:$0xff]   ;;  %v4388_v26 = vld [vmem:[%s6451_s1 + $0x1ec] ss:$24 sps:$4 sm:$0xff]  }
  0x54   :  { %3053 = vmatprep.subr.bf16.mxu0 %v4241_v31  ;;  %3095 = vmatpush1.bf16.msra.mxu1 %v4236_v32  ;;  %v4313_v31 = vld [vmem:[%s6451_s1 + $0xd24] ss:$24 sps:$4 sm:$0xff]   ;;  %v4308_v32 = vld [vmem:[%s6451_s1 + $0x158] ss:$24 sps:$4 sm:$0xff]  }
  0x55   :  { %3096 = vmatprep.subr.bf16.mxu1 %v4244_v33  ;;  %v4316_v33 = vld [vmem:[%s6451_s1 + $0x12c] ss:$24 sps:$4 sm:$0xff]  }
  0x57   :  { %3054 = vmatpush1.bf16.msra.mxu0 %v4239_v34  ;;  %v4311_v34 = vld [vmem:[%s6451_s1 + $0xd20] ss:$24 sps:$4 sm:$0xff]  }
  0x58   :  { %3055 = vmatprep.subr.bf16.mxu0 %v4247_v35  ;;  %3097 = vmatpush1.bf16.msra.mxu1 %v4242_v36  ;;  %v4319_v35 = vld [vmem:[%s6451_s1 + $0xcf4] ss:$24 sps:$4 sm:$0xff]   ;;  %v4314_v36 = vld [vmem:[%s6451_s1 + $0x128] ss:$24 sps:$4 sm:$0xff]  }
  0x59   :  { %3098 = vmatprep.subr.bf16.mxu1 %v4250_v37  ;;  %v24_v37 = vld [vmem:[%s6450_s0 + $0x48] sm:$0xff] }
  0x5b   :  { %3056 = vmatpush1.bf16.msra.mxu0 %v4245_v38  ;;  %v34_v38 = vld [vmem:[%s6450_s0 + $0x98] sm:$0xff] }
  0x5c   :  { %3057 = vmatprep.subr.bf16.mxu0 %v4253_v39  ;;  %3099 = vmatpush1.bf16.msra.mxu1 %v4248_v42  ;;  %v4322_v39 = vld [vmem:[%s6451_s1 + $0xfc] ss:$24 sps:$4 sm:$0xff]   ;;  %v5371_v40 = vpack.c.bf16 %v34_v38, %v24_v37  ;;  %v4400_v37 = vld [vmem:[%s6451_s1 + $0x18c] ss:$24 sps:$4 sm:$0xff]  }
  0x5d   :  { %3100 = vmatprep.subr.bf16.mxu1 %v4256_v44  ;;  %v4325_v42 = vld [vmem:[%s6451_s1 + $0xcc4] ss:$24 sps:$4 sm:$0xff]   ;;  %v4320_v44 = vld [vmem:[%s6451_s1 + $0xf8] ss:$24 sps:$4 sm:$0xff]  }
  0x5e   :  { %v23_v38 = vld [vmem:[%s6450_s0 + $0x40] sm:$0xff] }
  0x5f   :  { %3058 = vmatpush1.bf16.msra.mxu0 %v4251_v46  ;;  %v4323_v46 = vld [vmem:[%s6451_s1 + $0xcc0] ss:$24 sps:$4 sm:$0xff]  }
  0x60   :  { %3059 = vmatprep.subr.bf16.mxu0 %v4259_v48  ;;  %3101 = vmatpush1.bf16.msra.mxu1 %v4254_v51  ;;  %v4326_v48 = vld [vmem:[%s6451_s1 + $0xc8] ss:$24 sps:$4 sm:$0xff]   ;;  %v4334_v51 = vld [vmem:[%s6451_s1 + $0x9c] ss:$24 sps:$4 sm:$0xff]  }
  0x61   :  { %3102 = vmatprep.subr.bf16.mxu1 %v4262_v52  ;;  %v4329_v52 = vld [vmem:[%s6451_s1 + $0xc90] ss:$24 sps:$4 sm:$0xff]  }
  0x63   :  { %3060 = vmatpush2.bf16.msra.mxu0 %v4257_v53  ;;  %v4337_v53 = vld [vmem:[%s6451_s1 + $0xc64] ss:$24 sps:$4 sm:$0xff]  }
  0x64   :  { %3061 = vmatprep.subr.bf16.mxu0 %v4265_v54  ;;  %3103 = vmatpush2.bf16.msra.mxu1 %v4260_v56  ;;  %v4332_v54 = vld [vmem:[%s6451_s1 + $0x98] ss:$24 sps:$4 sm:$0xff]   ;;  %v4340_v56 = vld [vmem:[%s6451_s1 + $0x6c] ss:$24 sps:$4 sm:$0xff]  }
  0x65   :  { %3104 = vmatprep.subr.bf16.mxu1 %v4268_v57  ;;  %v4335_v57 = vld [vmem:[%s6451_s1 + $0xc60] ss:$24 sps:$4 sm:$0xff]  }
  0x67   :  { %3062 = vmatpush2.bf16.msra.mxu0 %v4263_v58  ;;  %v4343_v58 = vld [vmem:[%s6451_s1 + $0xc34] ss:$24 sps:$4 sm:$0xff]  }
  0x68   :  { %3063 = vmatprep.subr.bf16.mxu0 %v4271_v59  ;;  %3105 = vmatpush2.bf16.msra.mxu1 %v4266_v60  ;;  %v4338_v59 = vld [vmem:[%s6451_s1 + $0x68] ss:$24 sps:$4 sm:$0xff]   ;;  %v4346_v60 = vld [vmem:[%s6451_s1 + $0x3c] ss:$24 sps:$4 sm:$0xff]  }
  0x69   :  { %3106 = vmatprep.subr.bf16.mxu1 %v4274_v61  ;;  %v4341_v61 = vld [vmem:[%s6451_s1 + $0xc30] ss:$24 sps:$4 sm:$0xff]  }
  0x6b   :  { %3064 = vmatpush2.bf16.msra.mxu0 %v4269_v62  ;;  %v4349_v62 = vld [vmem:[%s6451_s1 + $0xc04] ss:$24 sps:$4 sm:$0xff]  }
  0x6c   :  { %3065 = vmatprep.subr.bf16.mxu0 %v4277_v63  ;;  %3107 = vmatpush2.bf16.msra.mxu1 %v4272_v0  ;;  %v4344_v63 = vld [vmem:[%s6451_s1 + $0x38] ss:$24 sps:$4 sm:$0xff]   ;;  %v4352_v0 = vld [vmem:[%s6451_s1 + $0xc] ss:$24 sps:$4 sm:$0xff]  }
  0x6d   :  { %3108 = vmatprep.subr.bf16.mxu1 %v4280_v1  ;;  %v4347_v1 = vld [vmem:[%s6451_s1 + $0xc00] ss:$24 sps:$4 sm:$0xff]  }
  0x6f   :  { %3066 = vmatpush2.bf16.msra.mxu0 %v4275_v2  ;;  %v4355_v2 = vld [vmem:[%s6451_s1 + $0xed4] ss:$24 sps:$4 sm:$0xff]  }
  0x70   :  { %3067 = vmatprep.subr.bf16.mxu0 %v4283_v3  ;;  %3109 = vmatpush2.bf16.msra.mxu1 %v4278_v4  ;;  %v4350_v3 = vld [vmem:[%s6451_s1 + $0x8] ss:$24 sps:$4 sm:$0xff]   ;;  %v4358_v4 = vld [vmem:[%s6451_s1 + $0x2dc] ss:$24 sps:$4 sm:$0xff]  }
  0x71   :  { %3110 = vmatprep.subr.bf16.mxu1 %v4286_v5  ;;  %v4353_v5 = vld [vmem:[%s6451_s1 + $0xed0] ss:$24 sps:$4 sm:$0xff]  }
  0x73   :  { %3068 = vmatpush2.bf16.msra.mxu0 %v4281_v6  ;;  %v4361_v6 = vld [vmem:[%s6451_s1 + $0xea4] ss:$24 sps:$4 sm:$0xff]  }
  0x74   :  { %3069 = vmatprep.subr.bf16.mxu0 %v4289_v7  ;;  %3111 = vmatpush2.bf16.msra.mxu1 %v4284_v8  ;;  %v4356_v7 = vld [vmem:[%s6451_s1 + $0x2d8] ss:$24 sps:$4 sm:$0xff]   ;;  %v4364_v8 = vld [vmem:[%s6451_s1 + $0x2ac] ss:$24 sps:$4 sm:$0xff]  }
  0x75   :  { %3112 = vmatprep.subr.bf16.mxu1 %v4292_v9  ;;  %v4359_v9 = vld [vmem:[%s6451_s1 + $0xea0] ss:$24 sps:$4 sm:$0xff]  }
  0x77   :  { %3070 = vmatpush2.bf16.msra.mxu0 %v4287_v10  ;;  %v4367_v10 = vld [vmem:[%s6451_s1 + $0xe74] ss:$24 sps:$4 sm:$0xff]  }
  0x78   :  { %3071 = vmatprep.subr.bf16.mxu0 %v4295_v12  ;;  %3113 = vmatpush2.bf16.msra.mxu1 %v4290_v13  ;;  %v4362_v12 = vld [vmem:[%s6451_s1 + $0x2a8] ss:$24 sps:$4 sm:$0xff]   ;;  %v4370_v13 = vld [vmem:[%s6451_s1 + $0x27c] ss:$24 sps:$4 sm:$0xff]  }
  0x79   :  { %3114 = vmatprep.subr.bf16.mxu1 %v4298_v15  ;;  %v4365_v15 = vld [vmem:[%s6451_s1 + $0xe70] ss:$24 sps:$4 sm:$0xff]  }
  0x7b   :  { %3072 = vmatpush2.bf16.msra.mxu0 %v4293_v16  ;;  %v4373_v16 = vld [vmem:[%s6451_s1 + $0xe44] ss:$24 sps:$4 sm:$0xff]  }
  0x7c   :  { %3073 = vmatprep.subr.bf16.mxu0 %v4301_v18  ;;  %3115 = vmatpush2.bf16.msra.mxu1 %v4296_v17  ;;  %v4368_v17 = vld [vmem:[%s6451_s1 + $0x278] ss:$24 sps:$4 sm:$0xff]   ;;  %v4376_v18 = vld [vmem:[%s6451_s1 + $0x24c] ss:$24 sps:$4 sm:$0xff]  }
  0x7d   :  { %3116 = vmatprep.subr.bf16.mxu1 %v4304_v20  ;;  %v4379_v20 = vld [vmem:[%s6451_s1 + $0xe14] ss:$24 sps:$4 sm:$0xff]  }
  0x7f   :  { %3074 = vmatpush2.bf16.msra.mxu0 %v4299_v19  ;;  %v4371_v19 = vld [vmem:[%s6451_s1 + $0xe40] ss:$24 sps:$4 sm:$0xff]  }
  0x80   :  { %3129 = vmatprep.subr.bf16.mxu0 %v4307_v24  ;;  %3117 = vmatpush2.bf16.msra.mxu1 %v4302_v22  ;;  %v4382_v22 = vld [vmem:[%s6451_s1 + $0x21c] ss:$24 sps:$4 sm:$0xff]  }
  0x81   :  { %3172 = vmatprep.subr.bf16.mxu1 %v4310_v28  ;;  %v4385_v24 = vld [vmem:[%s6451_s1 + $0xde4] ss:$24 sps:$4 sm:$0xff]   ;;  %v4383_v28 = vld [vmem:[%s6451_s1 + $0xde0] ss:$24 sps:$4 sm:$0xff]  }
  0x82   :  { %3076 = vmatmul.mubr.bf16.vlgmr.msra.gmra.mxu0 %v5331_v27 }
  0x83   :  { %3130 = vmatpush1.bf16.msra.mxu0 %v4305_v29  ;;  %3119 = vmatmul.mubr.bf16.vlgmr.msra.gmra.mxu1 %v5339_v30  ;;  %v4391_v29 = vld [vmem:[%s6451_s1 + $0xdb4] ss:$24 sps:$4 sm:$0xff]  }
  0x84   :  { %3131 = vmatprep.subr.bf16.mxu0 %v4313_v31  ;;  %3173 = vmatpush1.bf16.msra.mxu1 %v4308_v32  ;;  %v4386_v31 = vld [vmem:[%s6451_s1 + $0x1e8] ss:$24 sps:$4 sm:$0xff]   ;;  %v4394_v32 = vld [vmem:[%s6451_s1 + $0x1bc] ss:$24 sps:$4 sm:$0xff]  }
  0x85   :  { %3204 = vmatprep.mubr.bf16.mxu1 %v5025_v49  ;;  %3174 = vmatprep.subr.bf16.mxu1 %v4316_v33  ;;  %v4389_v33 = vld [vmem:[%s6451_s1 + $0xdb0] ss:$24 sps:$4 sm:$0xff]  }
  0x86   :  { %3161 = vmatprep.mubr.bf16.mxu0 %v5371_v40 }
  0x87   :  { %3132 = vmatpush1.bf16.msra.mxu0 %v4311_v34  ;;  %v4397_v34 = vld [vmem:[%s6451_s1 + $0xd84] ss:$24 sps:$4 sm:$0xff]  }
  0x88   :  { %3133 = vmatprep.subr.bf16.mxu0 %v4319_v35  ;;  %3175 = vmatpush1.bf16.msra.mxu1 %v4314_v36  ;;  %v4392_v35 = vld [vmem:[%s6451_s1 + $0x1b8] ss:$24 sps:$4 sm:$0xff]  }
  0x89   :  { %3176 = vmatprep.subr.bf16.mxu1 %v4322_v39  ;;  %v4395_v36 = vld [vmem:[%s6451_s1 + $0xd80] ss:$24 sps:$4 sm:$0xff]   ;;  %v33_v39 = vld [vmem:[%s6450_s0 + $0x90] sm:$0xff] }
  0x8b   :  { %3134 = vmatpush1.bf16.msra.mxu0 %v4317_v41  ;;  %v4403_v41 = vld [vmem:[%s6451_s1 + $0x45c] ss:$24 sps:$4 sm:$0xff]  }
  0x8c   :  { %3135 = vmatprep.subr.bf16.mxu0 %v4325_v42  ;;  %3177 = vmatpush1.bf16.msra.mxu1 %v4320_v44  ;;  %v4398_v42 = vld [vmem:[%s6451_s1 + $0x188] ss:$24 sps:$4 sm:$0xff]   ;;  %v5545_v44 = vpack.c.bf16 %v33_v39, %v23_v38  ;;  %v4481_v38 = vld [vmem:[%s6451_s1 + $0x4ec] ss:$24 sps:$4 sm:$0xff]   ;;  %v4476_v39 = vld [vmem:[%s6451_s1 + $0x818] ss:$24 sps:$4 sm:$0xff]  }
  0x8d   :  { %3178 = vmatprep.subr.bf16.mxu1 %v4328_v45  ;;  %v4406_v45 = vld [vmem:[%s6451_s1 + $0x75c] ss:$24 sps:$4 sm:$0xff]  }
  0x8f   :  { %3136 = vmatpush1.bf16.msra.mxu0 %v4323_v46  ;;  %v4401_v46 = vld [vmem:[%s6451_s1 + $0x458] ss:$24 sps:$4 sm:$0xff]  }
  0x90   :  { %3137 = vmatprep.subr.bf16.mxu0 %v4331_v47  ;;  %3179 = vmatpush1.bf16.msra.mxu1 %v4326_v48  ;;  %v4409_v47 = vld [vmem:[%s6451_s1 + $0x42c] ss:$24 sps:$4 sm:$0xff]   ;;  %v4404_v48 = vld [vmem:[%s6451_s1 + $0x758] ss:$24 sps:$4 sm:$0xff]  }
  0x91   :  { %3180 = vmatprep.subr.bf16.mxu1 %v4334_v51  ;;  %v4412_v51 = vld [vmem:[%s6451_s1 + $0x72c] ss:$24 sps:$4 sm:$0xff]  }
  0x93   :  { %3138 = vmatpush1.bf16.msra.mxu0 %v4329_v52  ;;  %v4407_v52 = vld [vmem:[%s6451_s1 + $0x428] ss:$24 sps:$4 sm:$0xff]  }
  0x94   :  { %3139 = vmatprep.subr.bf16.mxu0 %v4337_v53  ;;  %3181 = vmatpush1.bf16.msra.mxu1 %v4332_v54  ;;  %v4415_v53 = vld [vmem:[%s6451_s1 + $0x3fc] ss:$24 sps:$4 sm:$0xff]   ;;  %v4410_v54 = vld [vmem:[%s6451_s1 + $0x728] ss:$24 sps:$4 sm:$0xff]  }
  0x95   :  { %3182 = vmatprep.subr.bf16.mxu1 %v4340_v56  ;;  %v4418_v56 = vld [vmem:[%s6451_s1 + $0x6fc] ss:$24 sps:$4 sm:$0xff]  }
  0x97   :  { %3140 = vmatpush1.bf16.msra.mxu0 %v4335_v57  ;;  %v4413_v57 = vld [vmem:[%s6451_s1 + $0x3f8] ss:$24 sps:$4 sm:$0xff]  }
  0x98   :  { %3141 = vmatprep.subr.bf16.mxu0 %v4343_v58  ;;  %3183 = vmatpush1.bf16.msra.mxu1 %v4338_v59  ;;  %v4421_v58 = vld [vmem:[%s6451_s1 + $0x3cc] ss:$24 sps:$4 sm:$0xff]   ;;  %v4416_v59 = vld [vmem:[%s6451_s1 + $0x6f8] ss:$24 sps:$4 sm:$0xff]  }
  0x99   :  { %3184 = vmatprep.subr.bf16.mxu1 %v4346_v60  ;;  %v4424_v60 = vld [vmem:[%s6451_s1 + $0x6cc] ss:$24 sps:$4 sm:$0xff]  }
  0x9b   :  { %3142 = vmatpush1.bf16.msra.mxu0 %v4341_v61  ;;  %v4419_v61 = vld [vmem:[%s6451_s1 + $0x3c8] ss:$24 sps:$4 sm:$0xff]  }
  0x9c   :  { %3143 = vmatprep.subr.bf16.mxu0 %v4349_v62  ;;  %3185 = vmatpush1.bf16.msra.mxu1 %v4344_v63  ;;  %v4427_v62 = vld [vmem:[%s6451_s1 + $0x39c] ss:$24 sps:$4 sm:$0xff]   ;;  %v4422_v63 = vld [vmem:[%s6451_s1 + $0x6c8] ss:$24 sps:$4 sm:$0xff]  }
  0x9d   :  { %3186 = vmatprep.subr.bf16.mxu1 %v4352_v0  ;;  %v4430_v0 = vld [vmem:[%s6451_s1 + $0x69c] ss:$24 sps:$4 sm:$0xff]  }
  0x9f   :  { %3144 = vmatpush1.bf16.msra.mxu0 %v4347_v1  ;;  %v4425_v1 = vld [vmem:[%s6451_s1 + $0x398] ss:$24 sps:$4 sm:$0xff]  }
  0xa0   :  { %3145 = vmatprep.subr.bf16.mxu0 %v4355_v2  ;;  %3187 = vmatpush1.bf16.msra.mxu1 %v4350_v3  ;;  %v4433_v2 = vld [vmem:[%s6451_s1 + $0x36c] ss:$24 sps:$4 sm:$0xff]   ;;  %v4428_v3 = vld [vmem:[%s6451_s1 + $0x698] ss:$24 sps:$4 sm:$0xff]  }
  0xa1   :  { %3188 = vmatprep.subr.bf16.mxu1 %v4358_v4  ;;  %v4436_v4 = vld [vmem:[%s6451_s1 + $0x66c] ss:$24 sps:$4 sm:$0xff]  }
  0xa3   :  { %3146 = vmatpush2.bf16.msra.mxu0 %v4353_v5  ;;  %v4431_v5 = vld [vmem:[%s6451_s1 + $0x368] ss:$24 sps:$4 sm:$0xff]  }
  0xa4   :  { %3147 = vmatprep.subr.bf16.mxu0 %v4361_v6  ;;  %3189 = vmatpush2.bf16.msra.mxu1 %v4356_v7  ;;  %v4439_v6 = vld [vmem:[%s6451_s1 + $0x33c] ss:$24 sps:$4 sm:$0xff]   ;;  %v4434_v7 = vld [vmem:[%s6451_s1 + $0x668] ss:$24 sps:$4 sm:$0xff]  }
  0xa5   :  { %3190 = vmatprep.subr.bf16.mxu1 %v4364_v8  ;;  %v4442_v8 = vld [vmem:[%s6451_s1 + $0x63c] ss:$24 sps:$4 sm:$0xff]  }
  0xa7   :  { %3148 = vmatpush2.bf16.msra.mxu0 %v4359_v9  ;;  %v4437_v9 = vld [vmem:[%s6451_s1 + $0x338] ss:$24 sps:$4 sm:$0xff]  }
  0xa8   :  { %3149 = vmatprep.subr.bf16.mxu0 %v4367_v10  ;;  %3191 = vmatpush2.bf16.msra.mxu1 %v4362_v12  ;;  %v4445_v10 = vld [vmem:[%s6451_s1 + $0x30c] ss:$24 sps:$4 sm:$0xff]   ;;  %v4440_v12 = vld [vmem:[%s6451_s1 + $0x638] ss:$24 sps:$4 sm:$0xff]  }
  0xa9   :  { %3192 = vmatprep.subr.bf16.mxu1 %v4370_v13  ;;  %v4448_v13 = vld [vmem:[%s6451_s1 + $0x60c] ss:$24 sps:$4 sm:$0xff]  }
  0xab   :  { %3150 = vmatpush2.bf16.msra.mxu0 %v4365_v15  ;;  %v4443_v15 = vld [vmem:[%s6451_s1 + $0x308] ss:$24 sps:$4 sm:$0xff]  }
  0xac   :  { %3151 = vmatprep.subr.bf16.mxu0 %v4373_v16  ;;  %3193 = vmatpush2.bf16.msra.mxu1 %v4368_v17  ;;  %v4451_v16 = vld [vmem:[%s6451_s1 + $0x5dc] ss:$24 sps:$4 sm:$0xff]   ;;  %v4446_v17 = vld [vmem:[%s6451_s1 + $0x608] ss:$24 sps:$4 sm:$0xff]  }
  0xad   :  { %3194 = vmatprep.subr.bf16.mxu1 %v4376_v18  ;;  %v4454_v18 = vld [vmem:[%s6451_s1 + $0x8dc] ss:$24 sps:$4 sm:$0xff]  }
  0xaf   :  { %3152 = vmatpush2.bf16.msra.mxu0 %v4371_v19  ;;  %v4449_v19 = vld [vmem:[%s6451_s1 + $0x5d8] ss:$24 sps:$4 sm:$0xff]  }
  0xb0   :  { %3153 = vmatprep.subr.bf16.mxu0 %v4379_v20  ;;  %3195 = vmatpush2.bf16.msra.mxu1 %v4374_v21  ;;  %v4457_v20 = vld [vmem:[%s6451_s1 + $0x5ac] ss:$24 sps:$4 sm:$0xff]   ;;  %v4452_v21 = vld [vmem:[%s6451_s1 + $0x8d8] ss:$24 sps:$4 sm:$0xff]  }
  0xb1   :  { %3196 = vmatprep.subr.bf16.mxu1 %v4382_v22  ;;  %v4460_v22 = vld [vmem:[%s6451_s1 + $0x8ac] ss:$24 sps:$4 sm:$0xff]  }
  0xb3   :  { %3154 = vmatpush2.bf16.msra.mxu0 %v4377_v23  ;;  %v4455_v23 = vld [vmem:[%s6451_s1 + $0x5a8] ss:$24 sps:$4 sm:$0xff]  }
  0xb4   :  { %3155 = vmatprep.subr.bf16.mxu0 %v4385_v24  ;;  %3197 = vmatpush2.bf16.msra.mxu1 %v4380_v25  ;;  %v4463_v24 = vld [vmem:[%s6451_s1 + $0x57c] ss:$24 sps:$4 sm:$0xff]   ;;  %v4458_v25 = vld [vmem:[%s6451_s1 + $0x8a8] ss:$24 sps:$4 sm:$0xff]  }
  0xb5   :  { %3198 = vmatprep.subr.bf16.mxu1 %v4388_v26  ;;  %v4466_v26 = vld [vmem:[%s6451_s1 + $0x87c] ss:$24 sps:$4 sm:$0xff]  }
  0xb7   :  { %3156 = vmatpush2.bf16.msra.mxu0 %v4383_v28  ;;  %v4461_v28 = vld [vmem:[%s6451_s1 + $0x578] ss:$24 sps:$4 sm:$0xff]  }
  0xb8   :  { %3157 = vmatprep.subr.bf16.mxu0 %v4391_v29  ;;  %3199 = vmatpush2.bf16.msra.mxu1 %v4386_v31  ;;  %v4469_v29 = vld [vmem:[%s6451_s1 + $0x54c] ss:$24 sps:$4 sm:$0xff]   ;;  %v4464_v31 = vld [vmem:[%s6451_s1 + $0x878] ss:$24 sps:$4 sm:$0xff]  }
  0xb9   :  { %3200 = vmatprep.subr.bf16.mxu1 %v4394_v32  ;;  %v4472_v32 = vld [vmem:[%s6451_s1 + $0x84c] ss:$24 sps:$4 sm:$0xff]  }
  0xbb   :  { %3158 = vmatpush2.bf16.msra.mxu0 %v4389_v33  ;;  %v4467_v33 = vld [vmem:[%s6451_s1 + $0x548] ss:$24 sps:$4 sm:$0xff]  }
  0xbc   :  { %3159 = vmatprep.subr.bf16.mxu0 %v4397_v34  ;;  %3201 = vmatpush2.bf16.msra.mxu1 %v4392_v35  ;;  %v4475_v34 = vld [vmem:[%s6451_s1 + $0x51c] ss:$24 sps:$4 sm:$0xff]   ;;  %v4470_v35 = vld [vmem:[%s6451_s1 + $0x848] ss:$24 sps:$4 sm:$0xff]  }
  0xbd   :  { %3202 = vmatprep.subr.bf16.mxu1 %v4400_v37  ;;  %v4473_v37 = vld [vmem:[%s6451_s1 + $0x518] ss:$24 sps:$4 sm:$0xff]  }
  0xbf   :  { %3160 = vmatpush2.bf16.msra.mxu0 %v4395_v36  ;;  %v4478_v36 = vld [vmem:[%s6451_s1 + $0x81c] ss:$24 sps:$4 sm:$0xff]  }
  0xc0   :  { %3215 = vmatprep.subr.bf16.mxu0 %v4403_v41  ;;  %3203 = vmatpush2.bf16.msra.mxu1 %v4398_v42  ;;  %v4484_v41 = vld [vmem:[%s6451_s1 + $0x7ec] ss:$24 sps:$4 sm:$0xff]   ;;  %v4479_v42 = vld [vmem:[%s6451_s1 + $0x4e8] ss:$24 sps:$4 sm:$0xff]  }
  0xc1   :  { %3258 = vmatprep.subr.bf16.mxu1 %v4406_v45  ;;  %v4487_v45 = vld [vmem:[%s6451_s1 + $0x4bc] ss:$24 sps:$4 sm:$0xff]  }
  0xc2   :  { %3162 = vmatmul.mubr.bf16.vlgmr.msra.gmra.mxu0 %v5545_v44 }
  0xc3   :  { %3216 = vmatpush1.bf16.msra.mxu0 %v4401_v46  ;;  %3247 = vmatprep.mubr.bf16.mxu0 %v5043_v55  ;;  %v4482_v46 = vld [vmem:[%s6451_s1 + $0x7e8] ss:$24 sps:$4 sm:$0xff]  }
  0xc4   :  { %3205 = vmatmul.mubr.bf16.vlgmr.msra.gmra.mxu1 %v5103_v11  ;;  %3217 = vmatprep.subr.bf16.mxu0 %v4409_v47  ;;  %v4490_v47 = vld [vmem:[%s6451_s1 + $0x7bc] ss:$24 sps:$4 sm:$0xff]  }
  0xc5   :  { %3259 = vmatpush1.bf16.msra.mxu1 %v4404_v48  ;;  %3290 = vmatprep.mubr.bf16.mxu1 %v5199_v43  ;;  %v4485_v48 = vld [vmem:[%s6451_s1 + $0x4b8] ss:$24 sps:$4 sm:$0xff]  }
  0xc6   :  { %3260 = vmatprep.subr.bf16.mxu1 %v4412_v51  ;;  %v4493_v51 = vld [vmem:[%s6451_s1 + $0x48c] ss:$24 sps:$4 sm:$0xff]  }
  0xc7   :  { %3218 = vmatpush1.bf16.msra.mxu0 %v4407_v52  ;;  %v4488_v52 = vld [vmem:[%s6451_s1 + $0x7b8] ss:$24 sps:$4 sm:$0xff]  }
  0xc8   :  { %3219 = vmatprep.subr.bf16.mxu0 %v4415_v53  ;;  %v4496_v53 = vld [vmem:[%s6451_s1 + $0x78c] ss:$24 sps:$4 sm:$0xff]  }
  0xc9   :  { %3261 = vmatpush1.bf16.msra.mxu1 %v4410_v54  ;;  %v4491_v54 = vld [vmem:[%s6451_s1 + $0x488] ss:$24 sps:$4 sm:$0xff]  }
  0xca   :  { %3262 = vmatprep.subr.bf16.mxu1 %v4418_v56  ;;  %v4499_v56 = vld [vmem:[%s6451_s1 + $0xa5c] ss:$24 sps:$4 sm:$0xff]  }
  0xcb   :  { %3220 = vmatpush1.bf16.msra.mxu0 %v4413_v57  ;;  %v4494_v57 = vld [vmem:[%s6451_s1 + $0x788] ss:$24 sps:$4 sm:$0xff]  }
  0xcc   :  { %3221 = vmatprep.subr.bf16.mxu0 %v4421_v58  ;;  %v4502_v58 = vld [vmem:[%s6451_s1 + $0xd5c] ss:$24 sps:$4 sm:$0xff]  }
  0xcd   :  { %3263 = vmatpush1.bf16.msra.mxu1 %v4416_v59  ;;  %v4497_v59 = vld [vmem:[%s6451_s1 + $0xa58] ss:$24 sps:$4 sm:$0xff]  }
  0xce   :  { %3264 = vmatprep.subr.bf16.mxu1 %v4424_v60  ;;  %v4505_v60 = vld [vmem:[%s6451_s1 + $0xa2c] ss:$24 sps:$4 sm:$0xff]  }
  0xcf   :  { %3222 = vmatpush1.bf16.msra.mxu0 %v4419_v61  ;;  %v4500_v61 = vld [vmem:[%s6451_s1 + $0xd58] ss:$24 sps:$4 sm:$0xff]  }
  0xd0   :  { %3223 = vmatprep.subr.bf16.mxu0 %v4427_v62  ;;  %v4508_v62 = vld [vmem:[%s6451_s1 + $0xd2c] ss:$24 sps:$4 sm:$0xff]  }
  0xd1   :  { %3265 = vmatpush1.bf16.msra.mxu1 %v4422_v63  ;;  %v4503_v63 = vld [vmem:[%s6451_s1 + $0xa28] ss:$24 sps:$4 sm:$0xff]  }
  0xd2   :  { %3266 = vmatprep.subr.bf16.mxu1 %v4430_v0  ;;  %v4511_v0 = vld [vmem:[%s6451_s1 + $0x9fc] ss:$24 sps:$4 sm:$0xff]  }
  0xd3   :  { %3224 = vmatpush1.bf16.msra.mxu0 %v4425_v1  ;;  %v4506_v1 = vld [vmem:[%s6451_s1 + $0xd28] ss:$24 sps:$4 sm:$0xff]  }
  0xd4   :  { %3225 = vmatprep.subr.bf16.mxu0 %v4433_v2  ;;  %v4514_v2 = vld [vmem:[%s6451_s1 + $0xcfc] ss:$24 sps:$4 sm:$0xff]  }
  0xd5   :  { %3267 = vmatpush1.bf16.msra.mxu1 %v4428_v3  ;;  %v4509_v3 = vld [vmem:[%s6451_s1 + $0x9f8] ss:$24 sps:$4 sm:$0xff]  }
  0xd6   :  { %3268 = vmatprep.subr.bf16.mxu1 %v4436_v4  ;;  %v4517_v4 = vld [vmem:[%s6451_s1 + $0x9cc] ss:$24 sps:$4 sm:$0xff]  }
  0xd7   :  { %3226 = vmatpush1.bf16.msra.mxu0 %v4431_v5  ;;  %v4512_v5 = vld [vmem:[%s6451_s1 + $0xcf8] ss:$24 sps:$4 sm:$0xff]  }
  0xd8   :  { %3227 = vmatprep.subr.bf16.mxu0 %v4439_v6  ;;  %v4520_v6 = vld [vmem:[%s6451_s1 + $0xccc] ss:$24 sps:$4 sm:$0xff]  }
  0xd9   :  { %3269 = vmatpush1.bf16.msra.mxu1 %v4434_v7  ;;  %v4515_v7 = vld [vmem:[%s6451_s1 + $0x9c8] ss:$24 sps:$4 sm:$0xff]  }
  0xda   :  { %3270 = vmatprep.subr.bf16.mxu1 %v4442_v8  ;;  %v4523_v8 = vld [vmem:[%s6451_s1 + $0x99c] ss:$24 sps:$4 sm:$0xff]  }
  0xdb   :  { %3228 = vmatpush1.bf16.msra.mxu0 %v4437_v9  ;;  %v4518_v9 = vld [vmem:[%s6451_s1 + $0xcc8] ss:$24 sps:$4 sm:$0xff]  }
  0xdc   :  { %3229 = vmatprep.subr.bf16.mxu0 %v4445_v10  ;;  %v4526_v10 = vld [vmem:[%s6451_s1 + $0xc9c] ss:$24 sps:$4 sm:$0xff]  }
  0xdd   :  { %3271 = vmatpush1.bf16.msra.mxu1 %v4440_v12  ;;  %v4521_v12 = vld [vmem:[%s6451_s1 + $0x998] ss:$24 sps:$4 sm:$0xff]  }
  0xde   :  { %3272 = vmatprep.subr.bf16.mxu1 %v4448_v13  ;;  %v4529_v13 = vld [vmem:[%s6451_s1 + $0x96c] ss:$24 sps:$4 sm:$0xff]  }
  0xdf   :  { %3230 = vmatpush1.bf16.msra.mxu0 %v4443_v15  ;;  %v4524_v15 = vld [vmem:[%s6451_s1 + $0xc98] ss:$24 sps:$4 sm:$0xff]  }
  0xe0   :  { %3231 = vmatprep.subr.bf16.mxu0 %v4451_v16  ;;  %v4532_v16 = vld [vmem:[%s6451_s1 + $0xc6c] ss:$24 sps:$4 sm:$0xff]  }
  0xe1   :  { %3273 = vmatpush1.bf16.msra.mxu1 %v4446_v17  ;;  %v4527_v17 = vld [vmem:[%s6451_s1 + $0x968] ss:$24 sps:$4 sm:$0xff]  }
  0xe2   :  { %3274 = vmatprep.subr.bf16.mxu1 %v4454_v18  ;;  %v4535_v18 = vld [vmem:[%s6451_s1 + $0x93c] ss:$24 sps:$4 sm:$0xff]  }
  0xe3   :  { %3232 = vmatpush2.bf16.msra.mxu0 %v4449_v19  ;;  %v4530_v19 = vld [vmem:[%s6451_s1 + $0xc68] ss:$24 sps:$4 sm:$0xff]  }
  0xe4   :  { %3233 = vmatprep.subr.bf16.mxu0 %v4457_v20  ;;  %v4538_v20 = vld [vmem:[%s6451_s1 + $0xc3c] ss:$24 sps:$4 sm:$0xff]  }
  0xe5   :  { %3275 = vmatpush2.bf16.msra.mxu1 %v4452_v21  ;;  %v4533_v21 = vld [vmem:[%s6451_s1 + $0x938] ss:$24 sps:$4 sm:$0xff]  }
  0xe6   :  { %3276 = vmatprep.subr.bf16.mxu1 %v4460_v22  ;;  %v4541_v22 = vld [vmem:[%s6451_s1 + $0x90c] ss:$24 sps:$4 sm:$0xff]  }
  0xe7   :  { %3234 = vmatpush2.bf16.msra.mxu0 %v4455_v23  ;;  %v4536_v23 = vld [vmem:[%s6451_s1 + $0xc38] ss:$24 sps:$4 sm:$0xff]  }
  0xe8   :  { %3235 = vmatprep.subr.bf16.mxu0 %v4463_v24  ;;  %v4544_v24 = vld [vmem:[%s6451_s1 + $0xc0c] ss:$24 sps:$4 sm:$0xff]  }
  0xe9   :  { %3277 = vmatpush2.bf16.msra.mxu1 %v4458_v25  ;;  %v4539_v25 = vld [vmem:[%s6451_s1 + $0x908] ss:$24 sps:$4 sm:$0xff]  }
  0xea   :  { %3278 = vmatprep.subr.bf16.mxu1 %v4466_v26  ;;  %v4547_v26 = vld [vmem:[%s6451_s1 + $0xbdc] ss:$24 sps:$4 sm:$0xff]  }
  0xeb   :  { %3236 = vmatpush2.bf16.msra.mxu0 %v4461_v28  ;;  %v4542_v28 = vld [vmem:[%s6451_s1 + $0xc08] ss:$24 sps:$4 sm:$0xff]  }
  0xec   :  { %3237 = vmatprep.subr.bf16.mxu0 %v4469_v29  ;;  %v4550_v29 = vld [vmem:[%s6451_s1 + $0xedc] ss:$24 sps:$4 sm:$0xff]  }
  0xed   :  { %3279 = vmatpush2.bf16.msra.mxu1 %v4464_v31  ;;  %v4545_v31 = vld [vmem:[%s6451_s1 + $0xbd8] ss:$24 sps:$4 sm:$0xff]  }
  0xee   :  { %3280 = vmatprep.subr.bf16.mxu1 %v4472_v32  ;;  %v4553_v32 = vld [vmem:[%s6451_s1 + $0xbac] ss:$24 sps:$4 sm:$0xff]  }
  0xef   :  { %3238 = vmatpush2.bf16.msra.mxu0 %v4467_v33  ;;  %v4548_v33 = vld [vmem:[%s6451_s1 + $0xed8] ss:$24 sps:$4 sm:$0xff]  }
  0xf0   :  { %3239 = vmatprep.subr.bf16.mxu0 %v4475_v34  ;;  %v4556_v34 = vld [vmem:[%s6451_s1 + $0xeac] ss:$24 sps:$4 sm:$0xff]  }
  0xf1   :  { %3281 = vmatpush2.bf16.msra.mxu1 %v4470_v35  ;;  %v4551_v35 = vld [vmem:[%s6451_s1 + $0xba8] ss:$24 sps:$4 sm:$0xff]  }
  0xf2   :  { %3282 = vmatprep.subr.bf16.mxu1 %v4478_v36  ;;  %v4559_v36 = vld [vmem:[%s6451_s1 + $0xb7c] ss:$24 sps:$4 sm:$0xff]  }
  0xf3   :  { %3240 = vmatpush2.bf16.msra.mxu0 %v4473_v37  ;;  %v4554_v37 = vld [vmem:[%s6451_s1 + $0xea8] ss:$24 sps:$4 sm:$0xff]  }
  0xf4   :  { %3241 = vmatprep.subr.bf16.mxu0 %v4481_v38  ;;  %v4562_v38 = vld [vmem:[%s6451_s1 + $0xe7c] ss:$24 sps:$4 sm:$0xff]  }
  0xf5   :  { %3283 = vmatpush2.bf16.msra.mxu1 %v4476_v39  ;;  %v4557_v39 = vld [vmem:[%s6451_s1 + $0xb78] ss:$24 sps:$4 sm:$0xff]  }
  0xf6   :  { %3284 = vmatprep.subr.bf16.mxu1 %v4484_v41  ;;  %v4565_v41 = vld [vmem:[%s6451_s1 + $0xb4c] ss:$24 sps:$4 sm:$0xff]  }
  0xf7   :  { %3242 = vmatpush2.bf16.msra.mxu0 %v4479_v42  ;;  %v4560_v42 = vld [vmem:[%s6451_s1 + $0xe78] ss:$24 sps:$4 sm:$0xff]  }
  0xf8   :  { %3243 = vmatprep.subr.bf16.mxu0 %v4487_v45  ;;  %v4568_v45 = vld [vmem:[%s6451_s1 + $0xe4c] ss:$24 sps:$4 sm:$0xff]  }
  0xf9   :  { %3285 = vmatpush2.bf16.msra.mxu1 %v4482_v46  ;;  %v4563_v46 = vld [vmem:[%s6451_s1 + $0xb48] ss:$24 sps:$4 sm:$0xff]  }
  0xfa   :  { %3286 = vmatprep.subr.bf16.mxu1 %v4490_v47  ;;  %v4571_v47 = vld [vmem:[%s6451_s1 + $0xb1c] ss:$24 sps:$4 sm:$0xff]  }
  0xfb   :  { %3244 = vmatpush2.bf16.msra.mxu0 %v4485_v48  ;;  %v4566_v48 = vld [vmem:[%s6451_s1 + $0xe48] ss:$24 sps:$4 sm:$0xff]  }
  0xfc   :  { %3245 = vmatprep.subr.bf16.mxu0 %v4493_v51  ;;  %v4574_v51 = vld [vmem:[%s6451_s1 + $0xe1c] ss:$24 sps:$4 sm:$0xff]  }
  0xfd   :  { %3287 = vmatpush2.bf16.msra.mxu1 %v4488_v52  ;;  %v4569_v52 = vld [vmem:[%s6451_s1 + $0xb18] ss:$24 sps:$4 sm:$0xff]  }
  0xfe   :  { %3288 = vmatprep.subr.bf16.mxu1 %v4496_v53  ;;  %v4577_v53 = vld [vmem:[%s6451_s1 + $0xaec] ss:$24 sps:$4 sm:$0xff]  }
  0xff   :  { %3246 = vmatpush2.bf16.msra.mxu0 %v4491_v54  ;;  %v4572_v54 = vld [vmem:[%s6451_s1 + $0xe18] ss:$24 sps:$4 sm:$0xff]  }
 0x100   :  { %3301 = vmatprep.subr.bf16.mxu0 %v4499_v56  ;;  %v4580_v56 = vld [vmem:[%s6451_s1 + $0xdec] ss:$24 sps:$4 sm:$0xff]  }
 0x101   :  { %3289 = vmatpush2.bf16.msra.mxu1 %v4494_v57  ;;  %v4575_v57 = vld [vmem:[%s6451_s1 + $0xae8] ss:$24 sps:$4 sm:$0xff]  }
 0x102   :  { %3248 = vmatmul.mubr.bf16.vlgmr.msra.gmra.mxu0 %v5111_v14  ;;  %3344 = vmatprep.subr.bf16.mxu1 %v4502_v58  ;;  %v4583_v58 = vld [vmem:[%s6451_s1 + $0xabc] ss:$24 sps:$4 sm:$0xff]  }
 0x103   :  { %3302 = vmatpush1.bf16.msra.mxu0 %v4497_v59  ;;  %3333 = vmatprep.mubr.bf16.mxu0 %v5217_v50  ;;  %v4578_v59 = vld [vmem:[%s6451_s1 + $0xde8] ss:$24 sps:$4 sm:$0xff]  }
 0x104   :  { %3291 = vmatmul.mubr.bf16.vlgmr.msra.gmra.mxu1 %v5331_v27  ;;  %3303 = vmatprep.subr.bf16.mxu0 %v4505_v60  ;;  %v4586_v60 = vld [vmem:[%s6451_s1 + $0xdbc] ss:$24 sps:$4 sm:$0xff]  }
 0x105   :  { %3345 = vmatpush1.bf16.msra.mxu1 %v4500_v61  ;;  %3376 = vmatprep.mubr.bf16.mxu1 %v5371_v40  ;;  %v4581_v61 = vld [vmem:[%s6451_s1 + $0xab8] ss:$24 sps:$4 sm:$0xff]  }
 0x106   :  { %3346 = vmatprep.subr.bf16.mxu1 %v4508_v62  ;;  %v4589_v62 = vld [vmem:[%s6451_s1 + $0xa8c] ss:$24 sps:$4 sm:$0xff]  }
 0x107   :  { %3304 = vmatpush1.bf16.msra.mxu0 %v4503_v63  ;;  %v4584_v63 = vld [vmem:[%s6451_s1 + $0xdb8] ss:$24 sps:$4 sm:$0xff]  }
 0x108   :  { %3305 = vmatprep.subr.bf16.mxu0 %v4511_v0  ;;  %v4592_v0 = vld [vmem:[%s6451_s1 + $0xd8c] ss:$24 sps:$4 sm:$0xff]  }
 0x109   :  { %3347 = vmatpush1.bf16.msra.mxu1 %v4506_v1 }
 0x10a   :  { %3348 = vmatprep.subr.bf16.mxu1 %v4514_v2 }
 0x10b   :  { %3306 = vmatpush1.bf16.msra.mxu0 %v4509_v3 }
 0x10c   :  { %3307 = vmatprep.subr.bf16.mxu0 %v4517_v4 }
 0x10d   :  { %3349 = vmatpush1.bf16.msra.mxu1 %v4512_v5 }
 0x10e   :  { %3350 = vmatprep.subr.bf16.mxu1 %v4520_v6 }
 0x10f   :  { %3308 = vmatpush1.bf16.msra.mxu0 %v4515_v7 }
 0x110   :  { %3309 = vmatprep.subr.bf16.mxu0 %v4523_v8 }
 0x111   :  { %3351 = vmatpush1.bf16.msra.mxu1 %v4518_v9 }
 0x112   :  { %3352 = vmatprep.subr.bf16.mxu1 %v4526_v10 }
 0x113   :  { %3310 = vmatpush1.bf16.msra.mxu0 %v4521_v12 }
 0x114   :  { %3311 = vmatprep.subr.bf16.mxu0 %v4529_v13 }
 0x115   :  { %3353 = vmatpush1.bf16.msra.mxu1 %v4524_v15 }
 0x116   :  { %3354 = vmatprep.subr.bf16.mxu1 %v4532_v16 }
 0x117   :  { %3312 = vmatpush1.bf16.msra.mxu0 %v4527_v17 }
 0x118   :  { %3313 = vmatprep.subr.bf16.mxu0 %v4535_v18 }
 0x119   :  { %3355 = vmatpush1.bf16.msra.mxu1 %v4530_v19 }
 0x11a   :  { %3356 = vmatprep.subr.bf16.mxu1 %v4538_v20 }
 0x11b   :  { %3314 = vmatpush1.bf16.msra.mxu0 %v4533_v21 }
 0x11c   :  { %3315 = vmatprep.subr.bf16.mxu0 %v4541_v22 }
 0x11d   :  { %3357 = vmatpush1.bf16.msra.mxu1 %v4536_v23 }
 0x11e   :  { %3358 = vmatprep.subr.bf16.mxu1 %v4544_v24 }
 0x11f   :  { %3316 = vmatpush1.bf16.msra.mxu0 %v4539_v25 }
 0x120   :  { %3317 = vmatprep.subr.bf16.mxu0 %v4547_v26 }
 0x121   :  { %3359 = vmatpush1.bf16.msra.mxu1 %v4542_v28 }
 0x122   :  { %3360 = vmatprep.subr.bf16.mxu1 %v4550_v29 }
 0x123   :  { %3318 = vmatpush2.bf16.msra.mxu0 %v4545_v31 }
 0x124   :  { %3319 = vmatprep.subr.bf16.mxu0 %v4553_v32 }
 0x125   :  { %3361 = vmatpush2.bf16.msra.mxu1 %v4548_v33 }
 0x126   :  { %3362 = vmatprep.subr.bf16.mxu1 %v4556_v34 }
 0x127   :  { %3320 = vmatpush2.bf16.msra.mxu0 %v4551_v35 }
 0x128   :  { %3321 = vmatprep.subr.bf16.mxu0 %v4559_v36 }
 0x129   :  { %3363 = vmatpush2.bf16.msra.mxu1 %v4554_v37 }
 0x12a   :  { %3364 = vmatprep.subr.bf16.mxu1 %v4562_v38 }
 0x12b   :  { %3322 = vmatpush2.bf16.msra.mxu0 %v4557_v39 }
 0x12c   :  { %3323 = vmatprep.subr.bf16.mxu0 %v4565_v41 }
 0x12d   :  { %3365 = vmatpush2.bf16.msra.mxu1 %v4560_v42 }
 0x12e   :  { %3366 = vmatprep.subr.bf16.mxu1 %v4568_v45 }
 0x12f   :  { %3324 = vmatpush2.bf16.msra.mxu0 %v4563_v46 }
 0x130   :  { %3325 = vmatprep.subr.bf16.mxu0 %v4571_v47 }
 0x131   :  { %3367 = vmatpush2.bf16.msra.mxu1 %v4566_v48 }
 0x132   :  { %3368 = vmatprep.subr.bf16.mxu1 %v4574_v51 }
 0x133   :  { %3326 = vmatpush2.bf16.msra.mxu0 %v4569_v52 }
 0x134   :  { %3327 = vmatprep.subr.bf16.mxu0 %v4577_v53 }
 0x135   :  { %3369 = vmatpush2.bf16.msra.mxu1 %v4572_v54 }
 0x136   :  { %3370 = vmatprep.subr.bf16.mxu1 %v4580_v56 }
 0x137   :  { %3328 = vmatpush2.bf16.msra.mxu0 %v4575_v57 }
 0x138   :  { %3329 = vmatprep.subr.bf16.mxu0 %v4583_v58 }
 0x139   :  { %3371 = vmatpush2.bf16.msra.mxu1 %v4578_v59 }
 0x13a   :  { %3372 = vmatprep.subr.bf16.mxu1 %v4586_v60 }
 0x13b   :  { %8 = vsyncpa [#allocation3], 0  ;;  %3330 = vmatpush2.bf16.msra.mxu0 %v4581_v61  ;;  %v4587_v1 = vld [vmem:[%s6451_s1 + $0xa88] ss:$24 sps:$4 sm:$0xff]   ;;  %v4595_v2 = vld [vmem:[%s6451_s1 + $0x164] ss:$24 sps:$4 sm:$0xff]   ;;  %v2991_v51 = vpop.f32.mrf.mxu0  ;;  %v527_v53 = vlaneseq  ;;  %v3034_v59 = vpop.f32.mrf.mxu1 }
 0x13c   :  { %3331 = vmatprep.subr.bf16.mxu0 %v4589_v62  ;;  %v4590_v3 = vld [vmem:[%s6451_s1 + $0xd88] ss:$24 sps:$4 sm:$0xff]   ;;  %v4598_v4 = vld [vmem:[%s6451_s1 + $0x464] ss:$24 sps:$4 sm:$0xff]   ;;  %v4601_v6 = vld [vmem:[%s6451_s1 + $0x134] ss:$24 sps:$4 sm:$0xff]  }
 0x13d   :  { %3373 = vmatpush2.bf16.msra.mxu1 %v4584_v63  ;;  %v4593_v5 = vld [vmem:[%s6451_s1 + $0x160] ss:$24 sps:$4 sm:$0xff]   ;;  %v4604_v8 = vld [vmem:[%s6451_s1 + $0x434] ss:$24 sps:$4 sm:$0xff]   ;;  %v4599_v9 = vld [vmem:[%s6451_s1 + $0x130] ss:$24 sps:$4 sm:$0xff]   ;;  %v2993_v58 = vpop.f32.mrf.mxu0 }
 0x13e   :  { %3374 = vmatprep.subr.bf16.mxu1 %v4592_v0  ;;  %v4596_v7 = vld [vmem:[%s6451_s1 + $0x460] ss:$24 sps:$4 sm:$0xff]   ;;  %v4607_v10 = vld [vmem:[%s6451_s1 + $0x104] ss:$24 sps:$4 sm:$0xff]   ;;  %v4602_v12 = vld [vmem:[%s6451_s1 + $0x430] ss:$24 sps:$4 sm:$0xff]  }
 0x13f   :  { %3332 = vmatpush2.bf16.msra.mxu0 %v4587_v1  ;;  %v4610_v13 = vld [vmem:[%s6451_s1 + $0x404] ss:$24 sps:$4 sm:$0xff]   ;;  %v4613_v15 = vld [vmem:[%s6451_s1 + $0xd4] ss:$24 sps:$4 sm:$0xff]   ;;  %v4611_v17 = vld [vmem:[%s6451_s1 + $0xd0] ss:$24 sps:$4 sm:$0xff]   ;;  %v2995_v1 = vpop.f32.mrf.mxu0 }
 0x140   :  { %3387 = vmatprep.subr.bf16.mxu0 %v4595_v2  ;;  %v4616_v16 = vld [vmem:[%s6451_s1 + $0x3d4] ss:$24 sps:$4 sm:$0xff]   ;;  %v4619_v18 = vld [vmem:[%s6451_s1 + $0xa4] ss:$24 sps:$4 sm:$0xff]   ;;  %v4614_v19 = vld [vmem:[%s6451_s1 + $0x3d0] ss:$24 sps:$4 sm:$0xff]   ;;  %v3036_v2 = vpop.f32.mrf.mxu1 }
 0x141   :  { %3375 = vmatpush2.bf16.msra.mxu1 %v4590_v3  ;;  %v4622_v20 = vld [vmem:[%s6451_s1 + $0x3a4] ss:$24 sps:$4 sm:$0xff]   ;;  %v4617_v21 = vld [vmem:[%s6451_s1 + $0xa0] ss:$24 sps:$4 sm:$0xff]   ;;  %v4625_v22 = vld [vmem:[%s6451_s1 + $0x74] ss:$24 sps:$4 sm:$0xff]  }
 0x142   :  { %3334 = vmatmul.mubr.bf16.vlgmr.msra.gmra.mxu0 %v5339_v30  ;;  %3430 = vmatprep.subr.bf16.mxu1 %v4598_v4  ;;  %v4620_v23 = vld [vmem:[%s6451_s1 + $0x3a0] ss:$24 sps:$4 sm:$0xff]   ;;  %v4628_v24 = vld [vmem:[%s6451_s1 + $0x374] ss:$24 sps:$4 sm:$0xff]   ;;  %v4623_v25 = vld [vmem:[%s6451_s1 + $0x70] ss:$24 sps:$4 sm:$0xff]  }
 0x143   :  { %3388 = vmatpush1.bf16.msra.mxu0 %v4593_v5  ;;  %3419 = vmatprep.mubr.bf16.mxu0 %v5025_v49  ;;  %v4605_v49 = vld [vmem:[%s6451_s1 + $0x100] ss:$24 sps:$4 sm:$0xff]   ;;  %v4631_v26 = vld [vmem:[%s6451_s1 + $0x44] ss:$24 sps:$4 sm:$0xff]   ;;  %v4626_v28 = vld [vmem:[%s6451_s1 + $0x370] ss:$24 sps:$4 sm:$0xff]  }
 0x144   :  { %3377 = vmatmul.mubr.bf16.vlgmr.msra.gmra.mxu1 %v5545_v44  ;;  %3389 = vmatprep.subr.bf16.mxu0 %v4601_v6  ;;  %v4634_v29 = vld [vmem:[%s6451_s1 + $0x344] ss:$24 sps:$4 sm:$0xff]   ;;  %v4629_v31 = vld [vmem:[%s6451_s1 + $0x40] ss:$24 sps:$4 sm:$0xff]   ;;  %v4637_v32 = vld [vmem:[%s6451_s1 + $0x14] ss:$24 sps:$4 sm:$0xff]  }
 0x145   :  { %3431 = vmatpush1.bf16.msra.mxu1 %v4596_v7  ;;  %3462 = vmatprep.mubr.bf16.mxu1 %v5043_v55  ;;  %v4608_v55 = vld [vmem:[%s6451_s1 + $0x400] ss:$24 sps:$4 sm:$0xff]   ;;  %v4640_v34 = vld [vmem:[%s6451_s1 + $0x314] ss:$24 sps:$4 sm:$0xff]   ;;  %v4635_v35 = vld [vmem:[%s6451_s1 + $0x10] ss:$24 sps:$4 sm:$0xff]  }
 0x146   :  { %3432 = vmatprep.subr.bf16.mxu1 %v4604_v8  ;;  %v4632_v33 = vld [vmem:[%s6451_s1 + $0x340] ss:$24 sps:$4 sm:$0xff]   ;;  %v4643_v36 = vld [vmem:[%s6451_s1 + $0x2e4] ss:$24 sps:$4 sm:$0xff]   ;;  %v4638_v37 = vld [vmem:[%s6451_s1 + $0x310] ss:$24 sps:$4 sm:$0xff]  }
 0x147   :  { %3390 = vmatpush1.bf16.msra.mxu0 %v4599_v9  ;;  %v4646_v38 = vld [vmem:[%s6451_s1 + $0x5e4] ss:$24 sps:$4 sm:$0xff]   ;;  %v4641_v39 = vld [vmem:[%s6451_s1 + $0x2e0] ss:$24 sps:$4 sm:$0xff]   ;;  %v4649_v41 = vld [vmem:[%s6451_s1 + $0x2b4] ss:$24 sps:$4 sm:$0xff]  }
 0x148   :  { %3391 = vmatprep.subr.bf16.mxu0 %v4607_v10  ;;  %v4644_v42 = vld [vmem:[%s6451_s1 + $0x5e0] ss:$24 sps:$4 sm:$0xff]   ;;  %v4652_v45 = vld [vmem:[%s6451_s1 + $0x5b4] ss:$24 sps:$4 sm:$0xff]   ;;  %v4647_v46 = vld [vmem:[%s6451_s1 + $0x2b0] ss:$24 sps:$4 sm:$0xff]   ;;  %v2997_v10 = vpop.f32.mrf.mxu0 }
 0x149   :  { %3433 = vmatpush1.bf16.msra.mxu1 %v4602_v12  ;;  %v4655_v47 = vld [vmem:[%s6451_s1 + $0x284] ss:$24 sps:$4 sm:$0xff]   ;;  %v4650_v48 = vld [vmem:[%s6451_s1 + $0x5b0] ss:$24 sps:$4 sm:$0xff]   ;;  %v4653_v54 = vld [vmem:[%s6451_s1 + $0x280] ss:$24 sps:$4 sm:$0xff]   ;;  %v3038_v12 = vpop.f32.mrf.mxu1 }
 0x14a   :  { %3434 = vmatprep.subr.bf16.mxu1 %v4610_v13  ;;  %v4658_v52 = vld [vmem:[%s6451_s1 + $0x584] ss:$24 sps:$4 sm:$0xff]   ;;  %v4661_v56 = vld [vmem:[%s6451_s1 + $0x254] ss:$24 sps:$4 sm:$0xff]   ;;  %v4656_v57 = vld [vmem:[%s6451_s1 + $0x580] ss:$24 sps:$4 sm:$0xff]  }
 0x14b   :  { %3392 = vmatpush1.bf16.msra.mxu0 %v4605_v49  ;;  %v4664_v60 = vld [vmem:[%s6451_s1 + $0x554] ss:$24 sps:$4 sm:$0xff]   ;;  %v6078_v61 = vshrl.u32 %v527_v53, 7  ;;  %v4659_v62 = vld [vmem:[%s6451_s1 + $0x250] ss:$24 sps:$4 sm:$0xff]  }
 0x14c   :  { %3393 = vmatprep.subr.bf16.mxu0 %v4613_v15  ;;  %v4667_v63 = vld [vmem:[%s6451_s1 + $0x224] ss:$24 sps:$4 sm:$0xff]   ;;  %v4662_v0 = vld [vmem:[%s6451_s1 + $0x550] ss:$24 sps:$4 sm:$0xff]   ;;  %v4665_v5 = vld [vmem:[%s6451_s1 + $0x220] ss:$24 sps:$4 sm:$0xff]  }
 0x14d   :  { %3435 = vmatpush1.bf16.msra.mxu1 %v4608_v55  ;;  %v4670_v3 = vld [vmem:[%s6451_s1 + $0x524] ss:$24 sps:$4 sm:$0xff]   ;;  %v529_v4 = vsub.s32 0, %v6078_v61  ;;  %v4673_v7 = vld [vmem:[%s6451_s1 + $0x1f4] ss:$24 sps:$4 sm:$0xff]   ;;  %v533_v8 = vsub.s32 1, %v6078_v61  ;;  %v3077_v55 = vpop.f32.mrf.mxu0 }
 0x14e   :  { %3436 = vmatprep.subr.bf16.mxu1 %v4616_v16  ;;  %v6099_v6 = vld [vmem:[%s6452_s2] sm:$0x3f]  ;;  %v4676_v13 = vld [vmem:[%s6451_s1 + $0x4f4] ss:$24 sps:$4 sm:$0xff]   ;;  %v4671_v15 = vld [vmem:[%s6451_s1 + $0x1f0] ss:$24 sps:$4 sm:$0xff]  }
 0x14f   :  { %3394 = vmatpush1.bf16.msra.mxu0 %v4611_v17  ;;  %v4668_v9 = vld [vmem:[%s6451_s1 + $0x520] ss:$24 sps:$4 sm:$0xff]   ;;  %v530_v49 = vrot.slane %v6099_v6, %v529_v4  ;;  %v4679_v16 = vld [vmem:[%s6451_s1 + $0x1c4] ss:$24 sps:$4 sm:$0xff]   ;;  %v534_v17 = vrot.slane %v6099_v6, %v533_v8 }
 0x150   :  { %3395 = vmatprep.subr.bf16.mxu0 %v4619_v18  ;;  %v4674_v18 = vld [vmem:[%s6451_s1 + $0x4f0] ss:$24 sps:$4 sm:$0xff]  }
 0x151   :  { %3437 = vmatpush1.bf16.msra.mxu1 %v4614_v19  ;;  %v3040_v19 = vpop.f32.mrf.mxu1 }
 0x152   :  { %3438 = vmatprep.subr.bf16.mxu1 %v4622_v20  ;;  %v4682_v20 = vld [vmem:[%s6451_s1 + $0x4c4] ss:$24 sps:$4 sm:$0xff]  }
 0x153   :  { %3396 = vmatpush1.bf16.msra.mxu0 %v4617_v21  ;;  %v2992_v21 = vadd.f32 %v2991_v51, %v530_v49 }
 0x154   :  { %3397 = vmatprep.subr.bf16.mxu0 %v4625_v22  ;;  %v4677_v22 = vld [vmem:[%s6451_s1 + $0x1c0] ss:$24 sps:$4 sm:$0xff]  }
 0x155   :  { %3439 = vmatpush1.bf16.msra.mxu1 %v4620_v23  ;;  %v3079_v23 = vpop.f32.mrf.mxu0 }
 0x156   :  { %3440 = vmatprep.subr.bf16.mxu1 %v4628_v24  ;;  %v3120_v24 = vpop.f32.mrf.mxu1 }
 0x157   :  { %3398 = vmatpush1.bf16.msra.mxu0 %v4623_v25  ;;  %v4685_v25 = vld [vmem:[%s6451_s1 + $0x194] ss:$24 sps:$4 sm:$0xff]  }
 0x158   :  { %3399 = vmatprep.subr.bf16.mxu0 %v4631_v26  ;;  %v2994_v26 = vadd.f32 %v2993_v58, %v534_v17 }
 0x159   :  { %3441 = vmatpush1.bf16.msra.mxu1 %v4626_v28  ;;  %v4680_v28 = vld [vmem:[%s6451_s1 + $0x4c0] ss:$24 sps:$4 sm:$0xff]  }
 0x15a   :  { %3442 = vmatprep.subr.bf16.mxu1 %v4634_v29  ;;  %v4688_v29 = vld [vmem:[%s6451_s1 + $0x494] ss:$24 sps:$4 sm:$0xff]  }
 0x15b   :  { %3400 = vmatpush1.bf16.msra.mxu0 %v4629_v31  ;;  %v3035_v31 = vadd.f32 %v3034_v59, %v2992_v21  ;;  %v4700_v59 = vld [vmem:[%s6451_s1 + $0xa34] ss:$24 sps:$4 sm:$0xff]  }
 0x15c   :  { %3401 = vmatprep.subr.bf16.mxu0 %v4637_v32  ;;  %v2996_v32 = vadd.f32 %v2995_v1, %v530_v49  ;;  %v4712_v49 = vld [vmem:[%s6451_s1 + $0x9d4] ss:$24 sps:$4 sm:$0xff]  }
 0x15d   :  { %3443 = vmatpush1.bf16.msra.mxu1 %v4632_v33  ;;  %v4683_v33 = vld [vmem:[%s6451_s1 + $0x190] ss:$24 sps:$4 sm:$0xff]   ;;  %v4724_v21 = vld [vmem:[%s6451_s1 + $0x974] ss:$24 sps:$4 sm:$0xff]  }
 0x15e   :  { %3444 = vmatprep.subr.bf16.mxu1 %v4640_v34  ;;  %v3081_v34 = vpop.f32.mrf.mxu0 }
 0x15f   :  { %3402 = vmatpush1.bf16.msra.mxu0 %v4635_v35  ;;  %v3122_v35 = vpop.f32.mrf.mxu1 }
 0x160   :  { %3403 = vmatprep.subr.bf16.mxu0 %v4643_v36  ;;  %v4691_v36 = vld [vmem:[%s6451_s1 + $0x764] ss:$24 sps:$4 sm:$0xff]  }
 0x161   :  { %3445 = vmatpush1.bf16.msra.mxu1 %v4638_v37  ;;  %v3037_v37 = vadd.f32 %v3036_v2, %v2994_v26  ;;  %v3124_v51 = vpop.f32.mrf.mxu1  ;;  %v4725_v26 = vld [vmem:[%s6451_s1 + $0x640] ss:$24 sps:$4 sm:$0xff]  }
 0x162   :  { %3446 = vmatprep.subr.bf16.mxu1 %v4646_v38  ;;  %v2998_v38 = vadd.f32 %v2997_v10, %v534_v17  ;;  %v4718_v17 = vld [vmem:[%s6451_s1 + $0x9a4] ss:$24 sps:$4 sm:$0xff]  }
 0x163   :  { %3404 = vmatpush2.bf16.msra.mxu0 %v4641_v39  ;;  %v3078_v39 = vadd.f32 %v3077_v55, %v3035_v31  ;;  %v3126_v1 = vpop.f32.mrf.mxu1  ;;  %v4715_v55 = vld [vmem:[%s6451_s1 + $0x6a4] ss:$24 sps:$4 sm:$0xff]   ;;  %v4736_v31 = vld [vmem:[%s6451_s1 + $0x914] ss:$24 sps:$4 sm:$0xff]  }
 0x164   :  { %3405 = vmatprep.subr.bf16.mxu0 %v4649_v41  ;;  %v4686_v41 = vld [vmem:[%s6451_s1 + $0x490] ss:$24 sps:$4 sm:$0xff]   ;;  %v3041_v53 = vadd.f32 %v3040_v19, %v2998_v38  ;;  %v4721_v19 = vld [vmem:[%s6451_s1 + $0x674] ss:$24 sps:$4 sm:$0xff]   ;;  %v4740_v38 = vld [vmem:[%s6451_s1 + $0xbe0] ss:$24 sps:$4 sm:$0xff]  }
 0x165   :  { %3447 = vmatpush2.bf16.msra.mxu1 %v4644_v42  ;;  %v4694_v42 = vld [vmem:[%s6451_s1 + $0xa64] ss:$24 sps:$4 sm:$0xff]  }
 0x166   :  { %3448 = vmatprep.subr.bf16.mxu1 %v4652_v45  ;;  %v3039_v45 = vadd.f32 %v3038_v12, %v2996_v32  ;;  %v4731_v32 = vld [vmem:[%s6451_s1 + $0x610] ss:$24 sps:$4 sm:$0xff]  }
 0x167   :  { %3406 = vmatpush2.bf16.msra.mxu0 %v4647_v46  ;;  %v3080_v46 = vadd.f32 %v3079_v23, %v3037_v37  ;;  %v4727_v23 = vld [vmem:[%s6451_s1 + $0x644] ss:$24 sps:$4 sm:$0xff]   ;;  %v4745_v37 = vld [vmem:[%s6451_s1 + $0x8b4] ss:$24 sps:$4 sm:$0xff]  }
 0x168   :  { %3407 = vmatprep.subr.bf16.mxu0 %v4655_v47  ;;  %v4689_v47 = vld [vmem:[%s6451_s1 + $0x760] ss:$24 sps:$4 sm:$0xff]  }
 0x169   :  { %3449 = vmatpush2.bf16.msra.mxu1 %v4650_v48  ;;  %v3083_v48 = vpop.f32.mrf.mxu0 }
 0x16a   :  { %3450 = vmatprep.subr.bf16.mxu1 %v4658_v52  ;;  %v4697_v52 = vld [vmem:[%s6451_s1 + $0x734] ss:$24 sps:$4 sm:$0xff]  }
 0x16b   :  { %3408 = vmatpush2.bf16.msra.mxu0 %v4653_v54  ;;  %v3121_v54 = vadd.f32 %v3120_v24, %v3078_v39  ;;  %v4722_v24 = vld [vmem:[%s6451_s1 + $0x970] ss:$24 sps:$4 sm:$0xff]   ;;  %v4748_v39 = vld [vmem:[%s6451_s1 + $0xbb4] ss:$24 sps:$4 sm:$0xff]  }
 0x16c   :  { %3409 = vmatprep.subr.bf16.mxu0 %v4661_v56  ;;  %v3082_v56 = vadd.f32 %v3081_v34, %v3039_v45  ;;  %v4734_v34 = vld [vmem:[%s6451_s1 + $0x910] ss:$24 sps:$4 sm:$0xff]  }
 0x16d   :  { %3451 = vmatpush2.bf16.msra.mxu1 %v4656_v57  ;;  %v4692_v57 = vld [vmem:[%s6451_s1 + $0xa60] ss:$24 sps:$4 sm:$0xff]   ;;  %v4746_v45 = vld [vmem:[%s6451_s1 + $0xbb0] ss:$24 sps:$4 sm:$0xff]  }
 0x16e   :  { %3452 = vmatprep.subr.bf16.mxu1 %v4664_v60  ;;  %v3123_v60 = vadd.f32 %v3122_v35, %v3080_v46  ;;  %v4742_v35 = vld [vmem:[%s6451_s1 + $0xbe4] ss:$24 sps:$4 sm:$0xff]  }
 0x16f   :  { %3410 = vmatpush2.bf16.msra.mxu0 %v4659_v62  ;;  %v3084_v62 = vadd.f32 %v3083_v48, %v3041_v53  ;;  %v4754_v46 = vld [vmem:[%s6451_s1 + $0xb84] ss:$24 sps:$4 sm:$0xff]   ;;  %v4757_v48 = vld [vmem:[%s6451_s1 + $0x854] ss:$24 sps:$4 sm:$0xff]   ;;  %v4755_v53 = vld [vmem:[%s6451_s1 + $0x850] ss:$24 sps:$4 sm:$0xff]  }
 0x170   :  { %3411 = vmatprep.subr.bf16.mxu0 %v4667_v63 }
 0x171   :  { %3453 = vmatpush2.bf16.msra.mxu1 %v4662_v0  ;;  %v4695_v0 = vld [vmem:[%s6451_s1 + $0x730] ss:$24 sps:$4 sm:$0xff]  }
 0x172   :  { %3454 = vmatprep.subr.bf16.mxu1 %v4670_v3  ;;  %v3125_v3 = vadd.f32 %v3124_v51, %v3082_v56  ;;  %v4752_v51 = vld [vmem:[%s6451_s1 + $0xb80] ss:$24 sps:$4 sm:$0xff]   ;;  %v4758_v56 = vld [vmem:[%s6451_s1 + $0xb50] ss:$24 sps:$4 sm:$0xff]  }
 0x173   :  { %3412 = vmatpush2.bf16.msra.mxu0 %v4665_v5  ;;  %v4698_v5 = vld [vmem:[%s6451_s1 + $0xa30] ss:$24 sps:$4 sm:$0xff]  }
 0x174   :  { %3413 = vmatprep.subr.bf16.mxu0 %v4673_v7  ;;  %v3127_v7 = vadd.f32 %v3126_v1, %v3084_v62  ;;  %v4772_v62 = vld [vmem:[%s6451_s1 + $0xaf4] ss:$24 sps:$4 sm:$0xff]   ;;  %v4770_v1 = vld [vmem:[%s6451_s1 + $0xaf0] ss:$24 sps:$4 sm:$0xff]  }
 0x175   :  { %3455 = vmatpush2.bf16.msra.mxu1 %v4668_v9  ;;  %v4701_v9 = vld [vmem:[%s6451_s1 + $0x700] ss:$24 sps:$4 sm:$0xff]  }
 0x176   :  { %3456 = vmatprep.subr.bf16.mxu1 %v4676_v13  ;;  %v4704_v13 = vld [vmem:[%s6451_s1 + $0xa00] ss:$24 sps:$4 sm:$0xff]  }
 0x177   :  { %3414 = vmatpush2.bf16.msra.mxu0 %v4671_v15  ;;  %v4707_v15 = vld [vmem:[%s6451_s1 + $0x6d0] ss:$24 sps:$4 sm:$0xff]  }
 0x178   :  { %3415 = vmatprep.subr.bf16.mxu0 %v4679_v16  ;;  %v4710_v16 = vld [vmem:[%s6451_s1 + $0x9d0] ss:$24 sps:$4 sm:$0xff]  }
 0x179   :  { %3457 = vmatpush2.bf16.msra.mxu1 %v4674_v18  ;;  %v4713_v18 = vld [vmem:[%s6451_s1 + $0x6a0] ss:$24 sps:$4 sm:$0xff]  }
 0x17a   :  { %3458 = vmatprep.subr.bf16.mxu1 %v4682_v20  ;;  %v4716_v20 = vld [vmem:[%s6451_s1 + $0x9a0] ss:$24 sps:$4 sm:$0xff]  }
 0x17b   :  { %3416 = vmatpush2.bf16.msra.mxu0 %v4677_v22  ;;  %v4719_v22 = vld [vmem:[%s6451_s1 + $0x670] ss:$24 sps:$4 sm:$0xff]  }
 0x17c   :  { %3417 = vmatprep.subr.bf16.mxu0 %v4685_v25  ;;  %v4730_v25 = vld [vmem:[%s6451_s1 + $0x944] ss:$24 sps:$4 sm:$0xff]  }
 0x17d   :  { %3459 = vmatpush2.bf16.msra.mxu1 %v4680_v28  ;;  %v4733_v28 = vld [vmem:[%s6451_s1 + $0x614] ss:$24 sps:$4 sm:$0xff]  }
 0x17e   :  { %3460 = vmatprep.subr.bf16.mxu1 %v4688_v29  ;;  %v4728_v29 = vld [vmem:[%s6451_s1 + $0x940] ss:$24 sps:$4 sm:$0xff]  }
 0x17f   :  { %3418 = vmatpush2.bf16.msra.mxu0 %v4683_v33  ;;  %v4739_v33 = vld [vmem:[%s6451_s1 + $0x8e4] ss:$24 sps:$4 sm:$0xff]  }
 0x180   :  { %3473 = vmatprep.subr.bf16.mxu0 %v4691_v36  ;;  %v4737_v36 = vld [vmem:[%s6451_s1 + $0x8e0] ss:$24 sps:$4 sm:$0xff]  }
 0x181   :  { %3461 = vmatpush2.bf16.msra.mxu1 %v4686_v41  ;;  %v4743_v41 = vld [vmem:[%s6451_s1 + $0x8b0] ss:$24 sps:$4 sm:$0xff]  }
 0x182   :  { %v3163_v58 = vpop.f32.mrf.mxu0  ;;  %3420 = vmatmul.mubr.bf16.vlgmr.msra.gmra.mxu0 %v5103_v11  ;;  %3516 = vmatprep.subr.bf16.mxu1 %v4694_v42  ;;  %v4703_v11 = vld [vmem:[%s6451_s1 + $0x704] ss:$24 sps:$4 sm:$0xff]  }
 0x183   :  { %v3164_v63 = vadd.f32 %v3163_v58, %v3121_v54  ;;  %3474 = vmatpush1.bf16.msra.mxu0 %v4689_v47  ;;  %3505 = vmatprep.mubr.bf16.mxu0 %v5199_v43  ;;  %v4751_v42 = vld [vmem:[%s6451_s1 + $0x884] ss:$24 sps:$4 sm:$0xff]   ;;  %v4749_v47 = vld [vmem:[%s6451_s1 + $0x880] ss:$24 sps:$4 sm:$0xff]  }
 0x184   :  { %v3165_v2 = vpop.f32.mrf.mxu0  ;;  %3463 = vmatmul.mubr.bf16.vlgmr.msra.gmra.mxu1 %v5111_v14  ;;  %3475 = vmatprep.subr.bf16.mxu0 %v4697_v52  ;;  %v4706_v14 = vld [vmem:[%s6451_s1 + $0xa04] ss:$24 sps:$4 sm:$0xff]   ;;  %v4760_v52 = vld [vmem:[%s6451_s1 + $0xb54] ss:$24 sps:$4 sm:$0xff]   ;;  %v4761_v58 = vld [vmem:[%s6451_s1 + $0x820] ss:$24 sps:$4 sm:$0xff]  }
 0x185   :  { %3602 = vst [vmem:[#allocation2] sm:$0xff] %v3164_v63  ;;  %v3166_v4 = vadd.f32 %v3165_v2, %v3123_v60  ;;  %3517 = vmatpush1.bf16.msra.mxu1 %v4692_v57  ;;  %3548 = vmatprep.mubr.bf16.mxu1 %v5217_v50  ;;  %v4709_v50 = vld [vmem:[%s6451_s1 + $0x6d4] ss:$24 sps:$4 sm:$0xff]   ;;  %v4763_v54 = vld [vmem:[%s6451_s1 + $0x824] ss:$24 sps:$4 sm:$0xff]  }
 0x186   :  { %v3167_v43 = vpop.f32.mrf.mxu0  ;;  %3518 = vmatprep.subr.bf16.mxu1 %v4700_v59  ;;  %v4766_v57 = vld [vmem:[%s6451_s1 + $0xb24] ss:$24 sps:$4 sm:$0xff]   ;;  %v4769_v59 = vld [vmem:[%s6451_s1 + $0x7f4] ss:$24 sps:$4 sm:$0xff]   ;;  %v4764_v60 = vld [vmem:[%s6451_s1 + $0xb20] ss:$24 sps:$4 sm:$0xff]  }
 0x187   :  { %3603 = vst [vmem:[#allocation2 + $0x8] sm:$0xff] %v3166_v4  ;;  %v3168_v8 = vadd.f32 %v3167_v43, %v3125_v3  ;;  %3476 = vmatpush1.bf16.msra.mxu0 %v4695_v0  ;;  %v4767_v63 = vld [vmem:[%s6451_s1 + $0x7f0] ss:$24 sps:$4 sm:$0xff]   ;;  %v4775_v0 = vld [vmem:[%s6451_s1 + $0x7c4] ss:$24 sps:$4 sm:$0xff]  }
 0x188   :  { %v3169_v10 = vpop.f32.mrf.mxu0  ;;  %3477 = vmatprep.subr.bf16.mxu0 %v4703_v11  ;;  %v4778_v2 = vld [vmem:[%s6451_s1 + $0xac4] ss:$24 sps:$4 sm:$0xff]   ;;  %v4773_v11 = vld [vmem:[%s6451_s1 + $0x7c0] ss:$24 sps:$4 sm:$0xff]   ;;  %v4781_v3 = vld [vmem:[%s6451_s1 + $0x794] ss:$24 sps:$4 sm:$0xff]  }
 0x189   :  { %3608 = vst [vmem:[#allocation2 + $0x30] sm:$0xff] %v3168_v8  ;;  %v3170_v12 = vadd.f32 %v3169_v10, %v3127_v7  ;;  %3519 = vmatpush1.bf16.msra.mxu1 %v4698_v5  ;;  %v4776_v4 = vld [vmem:[%s6451_s1 + $0xac0] ss:$24 sps:$4 sm:$0xff]   ;;  %v4784_v5 = vld [vmem:[%s6451_s1 + $0xa94] ss:$24 sps:$4 sm:$0xff]  }
 0x18a   :  { %3520 = vmatprep.subr.bf16.mxu1 %v4706_v14  ;;  %v4779_v43 = vld [vmem:[%s6451_s1 + $0x790] ss:$24 sps:$4 sm:$0xff]   ;;  %v4787_v14 = vld [vmem:[%s6451_s1 + $0xd64] ss:$24 sps:$4 sm:$0xff]   ;;  %v4785_v8 = vld [vmem:[%s6451_s1 + $0xd60] ss:$24 sps:$4 sm:$0xff]  }
 0x18b   :  { %3609 = vst [vmem:[#allocation2 + $0x38] sm:$0xff] %v3170_v12  ;;  %3478 = vmatpush1.bf16.msra.mxu0 %v4701_v9  ;;  %v4782_v7 = vld [vmem:[%s6451_s1 + $0xa90] ss:$24 sps:$4 sm:$0xff]   ;;  %v4790_v9 = vld [vmem:[%s6451_s1 + $0xd34] ss:$24 sps:$4 sm:$0xff]  }
 0x18c   :  { %3479 = vmatprep.subr.bf16.mxu0 %v4709_v50  ;;  %v4788_v10 = vld [vmem:[%s6451_s1 + $0xd30] ss:$24 sps:$4 sm:$0xff]   ;;  %v4793_v50 = vld [vmem:[%s6451_s1 + $0xd04] ss:$24 sps:$4 sm:$0xff]   ;;  %v4791_v12 = vld [vmem:[%s6451_s1 + $0xd00] ss:$24 sps:$4 sm:$0xff]  }
 0x18d   :  { %3521 = vmatpush1.bf16.msra.mxu1 %v4704_v13  ;;  %v4797_v13 = vld [vmem:[%s6451_s1 + $0xca0] ss:$24 sps:$4 sm:$0xff]  }
 0x18e   :  { %3522 = vmatprep.subr.bf16.mxu1 %v4712_v49  ;;  %v4802_v49 = vld [vmem:[%s6451_s1 + $0xc74] ss:$24 sps:$4 sm:$0xff]  }
 0x18f   :  { %3480 = vmatpush1.bf16.msra.mxu0 %v4707_v15  ;;  %v4800_v15 = vld [vmem:[%s6451_s1 + $0xc70] ss:$24 sps:$4 sm:$0xff]  }
 0x190   :  { %3481 = vmatprep.subr.bf16.mxu0 %v4715_v55  ;;  %v4805_v55 = vld [vmem:[%s6451_s1 + $0xc44] ss:$24 sps:$4 sm:$0xff]  }
 0x191   :  { %3523 = vmatpush1.bf16.msra.mxu1 %v4710_v16  ;;  %v4803_v16 = vld [vmem:[%s6451_s1 + $0xc40] ss:$24 sps:$4 sm:$0xff]  }
 0x192   :  { %3524 = vmatprep.subr.bf16.mxu1 %v4718_v17  ;;  %v4808_v17 = vld [vmem:[%s6451_s1 + $0xc14] ss:$24 sps:$4 sm:$0xff]  }
 0x193   :  { %3482 = vmatpush1.bf16.msra.mxu0 %v4713_v18  ;;  %v4806_v18 = vld [vmem:[%s6451_s1 + $0xc10] ss:$24 sps:$4 sm:$0xff]  }
 0x194   :  { %3483 = vmatprep.subr.bf16.mxu0 %v4721_v19  ;;  %v4811_v19 = vld [vmem:[%s6451_s1 + $0xee4] ss:$24 sps:$4 sm:$0xff]  }
 0x195   :  { %3525 = vmatpush1.bf16.msra.mxu1 %v4716_v20  ;;  %v4809_v20 = vld [vmem:[%s6451_s1 + $0xee0] ss:$24 sps:$4 sm:$0xff]  }
 0x196   :  { %3526 = vmatprep.subr.bf16.mxu1 %v4724_v21  ;;  %v4814_v21 = vld [vmem:[%s6451_s1 + $0xeb4] ss:$24 sps:$4 sm:$0xff]  }
 0x197   :  { %3484 = vmatpush1.bf16.msra.mxu0 %v4719_v22  ;;  %v4812_v22 = vld [vmem:[%s6451_s1 + $0xeb0] ss:$24 sps:$4 sm:$0xff]  }
 0x198   :  { %3485 = vmatprep.subr.bf16.mxu0 %v4727_v23  ;;  %v4817_v23 = vld [vmem:[%s6451_s1 + $0xe84] ss:$24 sps:$4 sm:$0xff]  }
 0x199   :  { %3527 = vmatpush1.bf16.msra.mxu1 %v4722_v24  ;;  %v3206_v24 = vpop.f32.mrf.mxu1 }
 0x19a   :  { %3528 = vmatprep.subr.bf16.mxu1 %v4730_v25  ;;  %v4815_v25 = vld [vmem:[%s6451_s1 + $0xe80] ss:$24 sps:$4 sm:$0xff]  }
 0x19b   :  { %3486 = vmatpush1.bf16.msra.mxu0 %v4725_v26  ;;  %v4820_v26 = vld [vmem:[%s6451_s1 + $0xe54] ss:$24 sps:$4 sm:$0xff]  }
 0x19c   :  { %3487 = vmatprep.subr.bf16.mxu0 %v4733_v28  ;;  %v3208_v28 = vpop.f32.mrf.mxu1 }
 0x19d   :  { %3529 = vmatpush1.bf16.msra.mxu1 %v4728_v29  ;;  %v4818_v29 = vld [vmem:[%s6451_s1 + $0xe50] ss:$24 sps:$4 sm:$0xff]  }
 0x19e   :  { %3530 = vmatprep.subr.bf16.mxu1 %v4736_v31  ;;  %v4823_v31 = vld [vmem:[%s6451_s1 + $0xe24] ss:$24 sps:$4 sm:$0xff]  }
 0x19f   :  { %3488 = vmatpush1.bf16.msra.mxu0 %v4731_v32  ;;  %v3210_v32 = vpop.f32.mrf.mxu1 }
 0x1a0   :  { %3489 = vmatprep.subr.bf16.mxu0 %v4739_v33  ;;  %v4821_v33 = vld [vmem:[%s6451_s1 + $0xe20] ss:$24 sps:$4 sm:$0xff]  }
 0x1a1   :  { %3531 = vmatpush1.bf16.msra.mxu1 %v4734_v34  ;;  %v4826_v34 = vld [vmem:[%s6451_s1 + $0xdf4] ss:$24 sps:$4 sm:$0xff]  }
 0x1a2   :  { %3532 = vmatprep.subr.bf16.mxu1 %v4742_v35  ;;  %v537_v35 = vsub.s32 2, %v6078_v61 }
 0x1a3   :  { %3490 = vmatpush2.bf16.msra.mxu0 %v4737_v36  ;;  %v3212_v36 = vpop.f32.mrf.mxu1 }
 0x1a4   :  { %3491 = vmatprep.subr.bf16.mxu0 %v4745_v37  ;;  %v541_v37 = vsub.s32 3, %v6078_v61 }
 0x1a5   :  { %3533 = vmatpush2.bf16.msra.mxu1 %v4740_v38  ;;  %v4824_v38 = vld [vmem:[%s6451_s1 + $0xdf0] ss:$24 sps:$4 sm:$0xff]  }
 0x1a6   :  { %3534 = vmatprep.subr.bf16.mxu1 %v4748_v39 }
 0x1a7   :  { %3492 = vmatpush2.bf16.msra.mxu0 %v4743_v41  ;;  %v4829_v41 = vld [vmem:[%s6451_s1 + $0xdc4] ss:$24 sps:$4 sm:$0xff]  }
 0x1a8   :  { %3493 = vmatprep.subr.bf16.mxu0 %v4751_v42  ;;  %v538_v42 = vrot.slane %v6099_v6, %v537_v35 }
 0x1a9   :  { %3535 = vmatpush2.bf16.msra.mxu1 %v4746_v45 }
 0x1aa   :  { %3536 = vmatprep.subr.bf16.mxu1 %v4754_v46  ;;  %v542_v46 = vrot.slane %v6099_v6, %v541_v37 }
 0x1ab   :  { %3494 = vmatpush2.bf16.msra.mxu0 %v4749_v47  ;;  %v4827_v47 = vld [vmem:[%s6451_s1 + $0xdc0] ss:$24 sps:$4 sm:$0xff]  }
 0x1ac   :  { %3495 = vmatprep.subr.bf16.mxu0 %v4757_v48 }
 0x1ad   :  { %3537 = vmatpush2.bf16.msra.mxu1 %v4752_v51  ;;  %v4832_v51 = vld [vmem:[%s6451_s1 + $0xd94] ss:$24 sps:$4 sm:$0xff]  }
 0x1ae   :  { %3538 = vmatprep.subr.bf16.mxu1 %v4760_v52  ;;  %v3207_v52 = vadd.f32 %v3206_v24, %v538_v42 }
 0x1af   :  { %3496 = vmatpush2.bf16.msra.mxu0 %v4755_v53 }
 0x1b0   :  { %3497 = vmatprep.subr.bf16.mxu0 %v4763_v54  ;;  %v3209_v54 = vadd.f32 %v3208_v28, %v542_v46 }
 0x1b1   :  { %3539 = vmatpush2.bf16.msra.mxu1 %v4758_v56  ;;  %v4830_v56 = vld [vmem:[%s6451_s1 + $0xd90] ss:$24 sps:$4 sm:$0xff]  }
 0x1b2   :  { %3540 = vmatprep.subr.bf16.mxu1 %v4766_v57 }
 0x1b3   :  { %3498 = vmatpush2.bf16.msra.mxu0 %v4761_v58 }
 0x1b4   :  { %3499 = vmatprep.subr.bf16.mxu0 %v4769_v59 }
 0x1b5   :  { %3541 = vmatpush2.bf16.msra.mxu1 %v4764_v60  ;;  %v3211_v60 = vadd.f32 %v3210_v32, %v538_v42 }
 0x1b6   :  { %3542 = vmatprep.subr.bf16.mxu1 %v4772_v62 }
 0x1b7   :  { %3500 = vmatpush2.bf16.msra.mxu0 %v4767_v63 }
 0x1b8   :  { %3501 = vmatprep.subr.bf16.mxu0 %v4775_v0  ;;  %v3213_v0 = vadd.f32 %v3212_v36, %v542_v46 }
 0x1b9   :  { %3543 = vmatpush2.bf16.msra.mxu1 %v4770_v1 }
 0x1ba   :  { %3544 = vmatprep.subr.bf16.mxu1 %v4778_v2 }
 0x1bb   :  { %3502 = vmatpush2.bf16.msra.mxu0 %v4773_v11 }
 0x1bc   :  { %3503 = vmatprep.subr.bf16.mxu0 %v4781_v3 }
 0x1bd   :  { %3545 = vmatpush2.bf16.msra.mxu1 %v4776_v4 }
 0x1be   :  { %3546 = vmatprep.subr.bf16.mxu1 %v4784_v5 }
 0x1bf   :  { %3504 = vmatpush2.bf16.msra.mxu0 %v4779_v43 }
 0x1c0   :  { %3559 = vmatprep.subr.bf16.mxu0 %v4787_v14 }
 0x1c1   :  { %3547 = vmatpush2.bf16.msra.mxu1 %v4782_v7 }
 0x1c2   :  { %3506 = vmatmul.mubr.bf16.vlgmr.msra.gmra.mxu0 %v5331_v27  ;;  %v4796_v27 = vld [vmem:[%s6451_s1 + $0xcd4] ss:$24 sps:$4 sm:$0xff]   ;;  %v3249_v39 = vpop.f32.mrf.mxu0 }
 0x1c3   :  { %3560 = vmatpush1.bf16.msra.mxu0 %v4785_v8  ;;  %3591 = vmatprep.mubr.bf16.mxu0 %v5371_v40  ;;  %v4799_v40 = vld [vmem:[%s6451_s1 + $0xca4] ss:$24 sps:$4 sm:$0xff]   ;;  %v3250_v58 = vadd.f32 %v3249_v39, %v3207_v52 }
 0x1c4   :  { %3549 = vmatmul.mubr.bf16.vlgmr.msra.gmra.mxu1 %v5339_v30  ;;  %3561 = vmatprep.subr.bf16.mxu0 %v4790_v9  ;;  %v4794_v30 = vld [vmem:[%s6451_s1 + $0xcd0] ss:$24 sps:$4 sm:$0xff]   ;;  %v3292_v45 = vpop.f32.mrf.mxu1  ;;  %v3251_v48 = vpop.f32.mrf.mxu0  ;;  %s4855_s1 = smov [#allocation2]  }
 0x1c5   :  { %v3252_v62 = vadd.f32 %v3251_v48, %v3209_v54  ;;  %v3293_v1 = vadd.f32 %v3292_v45, %v3250_v58  ;;  %s3619_s13 = sshll.u32 %s4855_s1, 4  ;;  %s3620_s13 = int_to_ptr.vmem [resolvable:$true] %s3619_s13 }
 0x1c6   :  { %v3294_v53 = vpop.f32.mrf.mxu1  ;;  %v3253_v57 = vpop.f32.mrf.mxu0  ;;  %s4833_s14 = scalar_lea.vmem %s3620_s13, 1536  ;;  %p4838_p1 = scmp.lt.s32.totalorder %s3620_s13, %s3620_s13 }
 0x1c7   :  { %3562 = vmatpush1.bf16.msra.mxu0 %v4788_v10  ;;  %v3254_v2 = vadd.f32 %v3253_v57, %v3211_v60  ;;  %v3295_v4 = vadd.f32 %v3294_v53, %v3252_v62  ;;  %p4834_p0 = scmp.ne.s32.totalorder %s3620_s13, %s4833_s14  ;;  %p4839_p2 = scmp.lt.s32.totalorder %s4833_s14, %s4833_s14 }
 0x1c8   :  { %3563 = vmatprep.subr.bf16.mxu0 %v4793_v50  ;;  %v3296_v59 = vpop.f32.mrf.mxu1  ;;  %v3255_v63 = vpop.f32.mrf.mxu0 }
 0x1c9   :  { %v3256_v5 = vadd.f32 %v3255_v63, %v3213_v0  ;;  %v3297_v8 = vadd.f32 %v3296_v59, %v3254_v2  ;;  %p4840_p3 = por %p4839_p2, %p4838_p1 }
 0x1ca   :  { %v3298_v11 = vpop.f32.mrf.mxu1 }
 0x1cb   :  { %3564 = vmatpush1.bf16.msra.mxu0 %v4791_v12  ;;  %p4841_p4 = pnand %p4840_p3, %p4834_p0 }
 0x1cc   :  { %3565 = vmatprep.subr.bf16.mxu0 %v4796_v27  ;;  %v3299_v27 = vadd.f32 %v3298_v11, %v3256_v5 }
 0x1cf   :  { %3566 = vmatpush1.bf16.msra.mxu0 %v4794_v30 }
 0x1d0   :  { %3567 = vmatprep.subr.bf16.mxu0 %v4799_v40 }
 0x1d3   :  { %3568 = vmatpush1.bf16.msra.mxu0 %v4797_v13 }
 0x1d4   :  { %3569 = vmatprep.subr.bf16.mxu0 %v4802_v49 }
 0x1d7   :  { %3570 = vmatpush1.bf16.msra.mxu0 %v4800_v15 }
 0x1d8   :  { %3571 = vmatprep.subr.bf16.mxu0 %v4805_v55 }
 0x1db   :  { %3572 = vmatpush1.bf16.msra.mxu0 %v4803_v16 }
 0x1dc   :  { %3573 = vmatprep.subr.bf16.mxu0 %v4808_v17 }
 0x1df   :  { %3574 = vmatpush1.bf16.msra.mxu0 %v4806_v18 }
 0x1e0   :  { %3575 = vmatprep.subr.bf16.mxu0 %v4811_v19 }
 0x1e3   :  { %3576 = vmatpush2.bf16.msra.mxu0 %v4809_v20 }
 0x1e4   :  { %3577 = vmatprep.subr.bf16.mxu0 %v4814_v21 }
 0x1e7   :  { %3578 = vmatpush2.bf16.msra.mxu0 %v4812_v22  ;;  %v545_v22 = vsub.s32 4, %v6078_v61 }
 0x1e8   :  { %3579 = vmatprep.subr.bf16.mxu0 %v4817_v23  ;;  %v549_v23 = vsub.s32 5, %v6078_v61 }
 0x1eb   :  { %3580 = vmatpush2.bf16.msra.mxu0 %v4815_v25 }
 0x1ec   :  { %3581 = vmatprep.subr.bf16.mxu0 %v4820_v26  ;;  %v546_v26 = vrot.slane %v6099_v6, %v545_v22 }
 0x1ef   :  { %3582 = vmatpush2.bf16.msra.mxu0 %v4818_v29  ;;  %v550_v29 = vrot.slane %v6099_v6, %v549_v23 }
 0x1f0   :  { %3583 = vmatprep.subr.bf16.mxu0 %v4823_v31 }
 0x1f3   :  { %3584 = vmatpush2.bf16.msra.mxu0 %v4821_v33 }
 0x1f4   :  { %3585 = vmatprep.subr.bf16.mxu0 %v4826_v34 }
 0x1f7   :  { %3586 = vmatpush2.bf16.msra.mxu0 %v4824_v38 }
 0x1f8   :  { %3587 = vmatprep.subr.bf16.mxu0 %v4829_v41 }
 0x1fb   :  { %3588 = vmatpush2.bf16.msra.mxu0 %v4827_v47 }
 0x1fc   :  { %3589 = vmatprep.subr.bf16.mxu0 %v4832_v51 }
 0x1ff   :  { %3590 = vmatpush2.bf16.msra.mxu0 %v4830_v56 }
 0x202   :  { %v3335_v3 = vpop.f32.mrf.mxu0  ;;  %3592 = vmatmul.mubr.bf16.vlgmr.msra.gmra.mxu0 %v5545_v44 }
 0x203   :  { %v3336_v43 = vadd.f32 %v3335_v3, %v3293_v1 }
 0x204   :  { %v3337_v14 = vpop.f32.mrf.mxu0  ;;  %v3378_v7 = vpop.f32.mrf.mxu1 }
 0x205   :  { %v3338_v9 = vadd.f32 %v3337_v14, %v3295_v4  ;;  %v3379_v10 = vadd.f32 %v3378_v7, %v3336_v43 }
 0x206   :  { %v3339_v50 = vpop.f32.mrf.mxu0  ;;  %v3380_v12 = vpop.f32.mrf.mxu1 }
 0x207   :  { %3604 = vst [vmem:[#allocation2 + $0x10] sm:$0xff] %v3379_v10  ;;  %v3340_v30 = vadd.f32 %v3339_v50, %v3297_v8  ;;  %v3381_v40 = vadd.f32 %v3380_v12, %v3338_v9 }
 0x208   :  { %v3341_v13 = vpop.f32.mrf.mxu0  ;;  %v3382_v49 = vpop.f32.mrf.mxu1 }
 0x209   :  { %3605 = vst [vmem:[#allocation2 + $0x18] sm:$0xff] %v3381_v40  ;;  %v3342_v15 = vadd.f32 %v3341_v13, %v3299_v27  ;;  %v3383_v55 = vadd.f32 %v3382_v49, %v3340_v30 }
 0x20a   :  { %v3384_v44 = vpop.f32.mrf.mxu1 }
 0x20b   :  { %3610 = vst [vmem:[#allocation2 + $0x40] sm:$0xff] %v3383_v55  ;;  %v3385_v16 = vadd.f32 %v3384_v44, %v3342_v15 }
 0x20d   :  { %3611 = vst [vmem:[#allocation2 + $0x48] sm:$0xff] %v3385_v16 }
 0x242   :  { %v3421_v17 = vpop.f32.mrf.mxu0 }
 0x243   :  { %v3422_v32 = vadd.f32 %v3421_v17, %v546_v26 }
 0x244   :  { %v3423_v18 = vpop.f32.mrf.mxu0  ;;  %v3464_v19 = vpop.f32.mrf.mxu1 }
 0x245   :  { %v3424_v35 = vadd.f32 %v3423_v18, %v550_v29  ;;  %v3465_v36 = vadd.f32 %v3464_v19, %v3422_v32 }
 0x246   :  { %v3425_v20 = vpop.f32.mrf.mxu0  ;;  %v3466_v21 = vpop.f32.mrf.mxu1 }
 0x247   :  { %v3426_v37 = vadd.f32 %v3425_v20, %v546_v26  ;;  %v3467_v41 = vadd.f32 %v3466_v21, %v3424_v35 }
 0x248   :  { %v3427_v24 = vpop.f32.mrf.mxu0  ;;  %v3468_v25 = vpop.f32.mrf.mxu1 }
 0x249   :  { %v3428_v42 = vadd.f32 %v3427_v24, %v550_v29  ;;  %v3469_v61 = vadd.f32 %v3468_v25, %v3426_v37 }
 0x24a   :  { %v3470_v31 = vpop.f32.mrf.mxu1 }
 0x24b   :  { %v3471_v51 = vadd.f32 %v3470_v31, %v3428_v42 }
 0x282   :  { %v3507_v28 = vpop.f32.mrf.mxu0 }
 0x283   :  { %v3508_v45 = vadd.f32 %v3507_v28, %v3465_v36 }
 0x284   :  { %v3509_v33 = vpop.f32.mrf.mxu0  ;;  %v3550_v34 = vpop.f32.mrf.mxu1 }
 0x285   :  { %v3510_v46 = vadd.f32 %v3509_v33, %v3467_v41  ;;  %v3551_v52 = vadd.f32 %v3550_v34, %v3508_v45 }
 0x286   :  { %v3511_v38 = vpop.f32.mrf.mxu0  ;;  %v3552_v39 = vpop.f32.mrf.mxu1 }
 0x287   :  { %v3512_v53 = vadd.f32 %v3511_v38, %v3469_v61  ;;  %v3553_v54 = vadd.f32 %v3552_v39, %v3510_v46 }
 0x288   :  { %v3513_v47 = vpop.f32.mrf.mxu0  ;;  %v3554_v48 = vpop.f32.mrf.mxu1 }
 0x289   :  { %v3514_v56 = vadd.f32 %v3513_v47, %v3471_v51  ;;  %v3555_v60 = vadd.f32 %v3554_v48, %v3512_v53 }
 0x28a   :  { %v3556_v58 = vpop.f32.mrf.mxu1 }
 0x28b   :  { %v3557_v0 = vadd.f32 %v3556_v58, %v3514_v56 }
 0x2c2   :  { %v3593_v6 = vpop.f32.mrf.mxu0 }
 0x2c3   :  { %v3594_v57 = vadd.f32 %v3593_v6, %v3551_v52 }
 0x2c4   :  { %v3595_v59 = vpop.f32.mrf.mxu0 }
 0x2c5   :  { %3606 = vst [vmem:[#allocation2 + $0x20] sm:$0xff] %v3594_v57  ;;  %v3596_v62 = vadd.f32 %v3595_v59, %v3553_v54 }
 0x2c6   :  { %v3597_v63 = vpop.f32.mrf.mxu0 }
 0x2c7   :  { %3607 = vst [vmem:[#allocation2 + $0x28] sm:$0xff] %v3596_v62  ;;  %v3598_v1 = vadd.f32 %v3597_v63, %v3555_v60 }
 0x2c8   :  { %v3599_v2 = vpop.f32.mrf.mxu0 }
 0x2c9   :  { %3612 = vst [vmem:[#allocation2 + $0x50] sm:$0xff] %v3598_v1  ;;  %v3600_v11 = vadd.f32 %v3599_v2, %v3557_v0 }
 0x2cb   :  { %3613 = vst [vmem:[#allocation2 + $0x58] sm:$0xff] %v3600_v11 }
 0x2cc   :  { %4844 = shalt.err (!%p4841_p4)
}
 0x2cd   :  { %s4856_s15 = smov 768   ;;  %s4857_s16 = smov 48  }
 0x2ce   :  { %3625 = dma.vmem_to_hbm [thread:$0]  %s3620_s13, 1536, %s6453_s3, [#allocation3], %s4856_s15, %s4856_s15, %s4857_s16  }
 0x2cf   :  { %4853 = dma.done.wait [#allocation3], 1536  }
 0x2d0   :  { %4854 = vsyncadd [#allocation3], 4294965760 }
 0x2d1   :  { %3629 = vsyncpa [#allocation3], 1 }

</bundles_post_ra>
